<compile_context>
chip_gen: v6e
topology: v6e:2x2x1
jax: 0.10.0
libtpu: 0.0.40
codegen_flags: <defaults>
</compile_context>

<pallas_src>
import jax
import jax.numpy as jnp
from jax.experimental import pallas as pl
from jax.experimental.pallas import tpu as pltpu

_LANE = 128


def _round_up(v, m=_LANE):
    return ((v + m - 1) // m) * m


def _pad2d(a, rows, cols):
    return jnp.pad(a, ((0, rows - a.shape[0]), (0, cols - a.shape[1])))


def _make_fused_kernel(num_hidden, num_nodes, num_classes):
    """Fused GCN forward: num_hidden x (GCN layer + PairNorm + tanh), then the
    output GCN layer + log_softmax over the real classes.

    Ref order: a_hat, x, (w_i, b_i) * num_hidden, w_out, b_out, out.
    A_hat / X / W refs are bf16 (pre-cast in the wrapper); biases are f32.
    """
    inv_n = 1.0 / float(num_nodes)

    def kernel(*refs):
        a_ref = refs[0]
        x_ref = refs[1]
        wo_ref = refs[2 + 2 * num_hidden]
        bo_ref = refs[3 + 2 * num_hidden]
        o_ref = refs[4 + 2 * num_hidden]

        a_bf = a_ref[...]                                # bf16 already
        n_pad = a_ref.shape[0]
        # Mask over the zero-padded node rows; hoisted, reused by every layer.
        row_mask = (jax.lax.broadcasted_iota(jnp.int32, (n_pad, 1), 0)
                    < num_nodes).astype(jnp.float32)

        h_bf = x_ref[...]                                # bf16 MXU activations
        for l in range(num_hidden):
            w = refs[2 + 2 * l][...]                     # bf16
            b = refs[3 + 2 * l][...]                     # f32
            # GCN layer: A_hat @ (H @ W) + b (projection first; bf16 MXU, f32 acc)
            hw = jnp.dot(h_bf, w, preferred_element_type=jnp.float32)
            z = jnp.dot(a_bf, hw.astype(jnp.bfloat16),
                        preferred_element_type=jnp.float32) + b
            # PairNorm ('PN', scale=1, eps=1e-5): padded rows only hold the
            # bias, so both statistics are masked and divided by the true N.
            col_mean = jnp.sum(z * row_mask, axis=0, keepdims=True) * inv_n
            zc = z - col_mean
            mean_sq = jnp.sum(zc * zc * row_mask, keepdims=True) * inv_n  # (1,1)
            zn = zc * jax.lax.rsqrt(jnp.float32(1e-5) + mean_sq)
            h_bf = jnp.tanh(zn).astype(jnp.bfloat16)

        # F.dropout in eval mode = identity; output layer + log_softmax(dim=1).
        hw = jnp.dot(h_bf, wo_ref[...], preferred_element_type=jnp.float32)
        logits = jnp.dot(a_bf, hw.astype(jnp.bfloat16),
                         preferred_element_type=jnp.float32) + bo_ref[...]
        # Mask padded class lanes so they don't contribute to the softmax sum.
        cls_mask = (jax.lax.broadcasted_iota(jnp.int32, logits.shape, 1)
                    < num_classes)
        lm = jnp.where(cls_mask, logits, jnp.float32(-1e30))
        m = jnp.max(lm, axis=1, keepdims=True)
        lse = jnp.log(jnp.sum(jnp.exp(lm - m), axis=1, keepdims=True)) + m
        o_ref[...] = lm - lse

    return kernel


def gcn_forward(x, a_hat, params, num_classes):
    """Runs the whole GCN forward in one fused pallas_call; returns [N, C]."""
    n = a_hat.shape[0]
    n_pad = _round_up(n)          # dense 128-lane node axis for A_hat / MXU
    hidden = params["hidden"]
    w_out, b_out = params["out"]

    # Pre-cast all MXU operands to bf16 in the wrapper (DMA/vreg savings);
    # pad only lane/output dims to 128 (contraction dims stay as-is).
    a_p = _pad2d(a_hat, n_pad, n_pad).astype(jnp.bfloat16)
    x_p = _pad2d(x, n_pad, x.shape[1]).astype(jnp.bfloat16)

    inputs = [a_p, x_p]
    prev_cols = x.shape[1]        # K dim of the next layer's weight
    for (w, b) in hidden:
        out_p = _round_up(w.shape[1])
        inputs.append(_pad2d(w, prev_cols, out_p).astype(jnp.bfloat16))
        inputs.append(_pad2d(b, 1, out_p))          # bias stays f32
        prev_cols = out_p
    c_pad = _round_up(w_out.shape[1])
    inputs.append(_pad2d(w_out, prev_cols, c_pad).astype(jnp.bfloat16))
    inputs.append(_pad2d(b_out, 1, c_pad))

    in_specs = [pl.BlockSpec(a.shape, lambda i: (0, 0)) for a in inputs]
    out_spec = pl.BlockSpec((n_pad, c_pad), lambda i: (0, 0))  # lane-dense store

    out = pl.pallas_call(
        _make_fused_kernel(len(hidden), n, num_classes),
        out_shape=jax.ShapeDtypeStruct((n_pad, c_pad), jnp.float32),
        grid=(1,),
        in_specs=in_specs,
        out_specs=out_spec,
        compiler_params=pltpu.CompilerParams(
            dimension_semantics=("parallel",)),
    )(*inputs)
    return out[:n, :num_classes]


def normalized_adjacency(edge_index, num_nodes):
    # A_hat = D^{-1/2} (A + I) D^{-1/2}; repeated edges are deduplicated.
    src, dst = edge_index[0], edge_index[1]
    a = jnp.zeros((num_nodes, num_nodes), jnp.float32)
    a = a.at[src, dst].set(1.0)
    a = a.at[dst, src].set(1.0)                                 # undirected
    a = jnp.maximum(a, jnp.eye(num_nodes, dtype=jnp.float32))   # self-loops
    deg = jnp.sum(a, axis=1)
    d_inv_sqrt = 1.0 / jnp.sqrt(deg)
    return a * d_inv_sqrt[:, None] * d_inv_sqrt[None, :]


if __name__ == "__main__":
    N = 32          # nodes
    F_IN = 16       # num_node_features
    HIDDEN = 16     # hidden_dims
    CLASSES = 8     # num_classes
    NUM_LAYERS = 3  # num_layers

    key = jax.random.PRNGKey(0)
    k_x, k_e, k_w = jax.random.split(key, 3)

    x = jax.random.normal(k_x, (N, F_IN), jnp.float32)

    # synthetic edge_index [2, E]: ring + a few random chords
    ring_src = jnp.arange(N, dtype=jnp.int32)
    ring_dst = (jnp.arange(N, dtype=jnp.int32) + 1) % N
    rand_src = jax.random.randint(k_e, (16,), 0, N, dtype=jnp.int32)
    rand_dst = jax.random.randint(jax.random.fold_in(k_e, 1), (16,), 0, N,
                                  dtype=jnp.int32)
    edge_index = jnp.stack([jnp.concatenate([ring_src, rand_src]),
                            jnp.concatenate([ring_dst, rand_dst])])

    a_hat = normalized_adjacency(edge_index, N)

    def glorot(k, shape):
        lim = jnp.sqrt(6.0 / (shape[0] + shape[1]))
        return jax.random.uniform(k, shape, jnp.float32, -lim, lim)

    dims = [(F_IN, HIDDEN)] + [(HIDDEN, HIDDEN)] * (NUM_LAYERS - 2)
    keys = jax.random.split(k_w, len(dims) + 1)
    hidden_params = [
        (glorot(keys[i], d), jnp.zeros((1, d[1]), jnp.float32))
        for i, d in enumerate(dims)
    ]
    out_params = (glorot(keys[-1], (HIDDEN, CLASSES)),
                  jnp.zeros((1, CLASSES), jnp.float32))
    params = {"hidden": hidden_params, "out": out_params}

    out = gcn_forward(x, a_hat, params, CLASSES)
    jax.block_until_ready(out)
    assert out.shape == (N, CLASSES)
    assert out.dtype == jnp.float32
    assert bool(jnp.all(jnp.isfinite(out)))
    print("KERNEL_OK")
</pallas_src>

<mosaic_0001>
module attributes {stable_mosaic.version = 11 : i64} {
  func.func @kernel(%arg0: i32, %arg1: memref<128x128xbf16, #tpu.memory_space<vmem>>, %arg2: memref<128x16xbf16, #tpu.memory_space<vmem>>, %arg3: memref<16x128xbf16, #tpu.memory_space<vmem>>, %arg4: memref<1x128xf32, #tpu.memory_space<vmem>>, %arg5: memref<128x128xbf16, #tpu.memory_space<vmem>>, %arg6: memref<1x128xf32, #tpu.memory_space<vmem>>, %arg7: memref<128x128xbf16, #tpu.memory_space<vmem>>, %arg8: memref<1x128xf32, #tpu.memory_space<vmem>>, %arg9: memref<128x128xf32, #tpu.memory_space<vmem>>) attributes {dimension_semantics = [#tpu.dimension_semantics<parallel>], iteration_bounds = array<i64: 1>, scalar_prefetch = 0 : i64, scratch_operands = 0 : i64, tpu.core_type = #tpu.core_type<tc>, window_params = [{pipeline_mode = #tpu.pipeline_mode<synchronous>, transform_indices = @transform_0, window_bounds = array<i64: 128, 128>}, {pipeline_mode = #tpu.pipeline_mode<synchronous>, transform_indices = @transform_1, window_bounds = array<i64: 128, 16>}, {pipeline_mode = #tpu.pipeline_mode<synchronous>, transform_indices = @transform_2, window_bounds = array<i64: 16, 128>}, {pipeline_mode = #tpu.pipeline_mode<synchronous>, transform_indices = @transform_3, window_bounds = array<i64: 1, 128>}, {pipeline_mode = #tpu.pipeline_mode<synchronous>, transform_indices = @transform_4, window_bounds = array<i64: 128, 128>}, {pipeline_mode = #tpu.pipeline_mode<synchronous>, transform_indices = @transform_5, window_bounds = array<i64: 1, 128>}, {pipeline_mode = #tpu.pipeline_mode<synchronous>, transform_indices = @transform_6, window_bounds = array<i64: 128, 128>}, {pipeline_mode = #tpu.pipeline_mode<synchronous>, transform_indices = @transform_7, window_bounds = array<i64: 1, 128>}, {pipeline_mode = #tpu.pipeline_mode<synchronous>, transform_indices = @transform_8, window_bounds = array<i64: 128, 128>}]} {
    %c0 = arith.constant 0 : index
    %c0_0 = arith.constant 0 : index
    %0 = vector.load %arg1[%c0, %c0_0] : memref<128x128xbf16, #tpu.memory_space<vmem>>, vector<128x128xbf16>
    %1 = tpu.iota {dimensions = array<i32: 0>} : vector<128x1xi32>
    %c32_i32 = arith.constant 32 : i32
    %2 = vector.broadcast %c32_i32 : i32 to vector<128x1xi32>
    %3 = arith.cmpi slt, %1, %2 : vector<128x1xi32>
    %4 = arith.extui %3 : vector<128x1xi1> to vector<128x1xi32>
    %5 = arith.sitofp %4 : vector<128x1xi32> to vector<128x1xf32>
    %c0_1 = arith.constant 0 : index
    %c0_2 = arith.constant 0 : index
    %6 = vector.load %arg2[%c0_1, %c0_2] : memref<128x16xbf16, #tpu.memory_space<vmem>>, vector<128x16xbf16>
    %c0_3 = arith.constant 0 : index
    %c0_4 = arith.constant 0 : index
    %7 = vector.load %arg3[%c0_3, %c0_4] : memref<16x128xbf16, #tpu.memory_space<vmem>>, vector<16x128xbf16>
    %c0_5 = arith.constant 0 : index
    %c0_6 = arith.constant 0 : index
    %8 = vector.load %arg4[%c0_5, %c0_6] : memref<1x128xf32, #tpu.memory_space<vmem>>, vector<1x128xf32>
    %cst = arith.constant dense<0.000000e+00> : vector<128x128xf32>
    %9 = tpu.matmul %6, %7, %cst {dimension_numbers = #tpu.dot_dimension_numbers<[1], [0], [0], [1], [0, 0, 1, 1], [], []>} : vector<128x16xbf16>, vector<16x128xbf16>, vector<128x128xf32> -> vector<128x128xf32>
    %10 = arith.truncf %9 : vector<128x128xf32> to vector<128x128xbf16>
    %cst_7 = arith.constant dense<0.000000e+00> : vector<128x128xf32>
    %11 = tpu.matmul %0, %10, %cst_7 {dimension_numbers = #tpu.dot_dimension_numbers<[1], [0], [0], [1], [0, 0, 1, 1], [], []>} : vector<128x128xbf16>, vector<128x128xbf16>, vector<128x128xf32> -> vector<128x128xf32>
    %12 = vector.broadcast %8 : vector<1x128xf32> to vector<128x128xf32>
    %13 = arith.addf %11, %12 : vector<128x128xf32>
    %14 = vector.broadcast %5 : vector<128x1xf32> to vector<128x128xf32>
    %15 = arith.mulf %13, %14 : vector<128x128xf32>
    %cst_8 = arith.constant dense<0.000000e+00> : vector<128xf32>
    %16 = vector.multi_reduction <add>, %15, %cst_8 [0] : vector<128x128xf32> to vector<128xf32>
    %17 = vector.shape_cast %16 : vector<128xf32> to vector<1x128xf32>
    %cst_9 = arith.constant 3.125000e-02 : f32
    %18 = vector.broadcast %cst_9 : f32 to vector<1x128xf32>
    %19 = arith.mulf %17, %18 : vector<1x128xf32>
    %20 = vector.broadcast %19 : vector<1x128xf32> to vector<128x128xf32>
    %21 = arith.subf %13, %20 : vector<128x128xf32>
    %22 = arith.mulf %21, %21 : vector<128x128xf32>
    %23 = vector.broadcast %5 : vector<128x1xf32> to vector<128x128xf32>
    %24 = arith.mulf %22, %23 : vector<128x128xf32>
    %25 = vector.shape_cast %24 : vector<128x128xf32> to vector<1x128x128xf32>
    %cst_10 = arith.constant dense<0.000000e+00> : vector<1xf32>
    %26 = vector.multi_reduction <add>, %25, %cst_10 [1, 2] : vector<1x128x128xf32> to vector<1xf32>
    %27 = vector.shape_cast %26 : vector<1xf32> to vector<1x1x1xf32>
    %28 = vector.extract %27[0, 0, 0] : f32 from vector<1x1x1xf32>
    %29 = vector.broadcast %28 : f32 to vector<1x1xf32>
    %cst_11 = arith.constant 3.125000e-02 : f32
    %30 = vector.broadcast %cst_11 : f32 to vector<1x1xf32>
    %31 = arith.mulf %29, %30 : vector<1x1xf32>
    %cst_12 = arith.constant 9.99999974E-6 : f32
    %32 = vector.broadcast %cst_12 : f32 to vector<1x1xf32>
    %33 = arith.addf %32, %31 : vector<1x1xf32>
    %34 = math.rsqrt %33 : vector<1x1xf32>
    %35 = vector.broadcast %34 : vector<1x1xf32> to vector<128x128xf32>
    %36 = arith.mulf %21, %35 : vector<128x128xf32>
    %37 = math.tanh %36 : vector<128x128xf32>
    %38 = arith.truncf %37 : vector<128x128xf32> to vector<128x128xbf16>
    %c0_13 = arith.constant 0 : index
    %c0_14 = arith.constant 0 : index
    %39 = vector.load %arg5[%c0_13, %c0_14] : memref<128x128xbf16, #tpu.memory_space<vmem>>, vector<128x128xbf16>
    %c0_15 = arith.constant 0 : index
    %c0_16 = arith.constant 0 : index
    %40 = vector.load %arg6[%c0_15, %c0_16] : memref<1x128xf32, #tpu.memory_space<vmem>>, vector<1x128xf32>
    %cst_17 = arith.constant dense<0.000000e+00> : vector<128x128xf32>
    %41 = tpu.matmul %38, %39, %cst_17 {dimension_numbers = #tpu.dot_dimension_numbers<[1], [0], [0], [1], [0, 0, 1, 1], [], []>} : vector<128x128xbf16>, vector<128x128xbf16>, vector<128x128xf32> -> vector<128x128xf32>
    %42 = arith.truncf %41 : vector<128x128xf32> to vector<128x128xbf16>
    %cst_18 = arith.constant dense<0.000000e+00> : vector<128x128xf32>
    %43 = tpu.matmul %0, %42, %cst_18 {dimension_numbers = #tpu.dot_dimension_numbers<[1], [0], [0], [1], [0, 0, 1, 1], [], []>} : vector<128x128xbf16>, vector<128x128xbf16>, vector<128x128xf32> -> vector<128x128xf32>
    %44 = vector.broadcast %40 : vector<1x128xf32> to vector<128x128xf32>
    %45 = arith.addf %43, %44 : vector<128x128xf32>
    %46 = vector.broadcast %5 : vector<128x1xf32> to vector<128x128xf32>
    %47 = arith.mulf %45, %46 : vector<128x128xf32>
    %cst_19 = arith.constant dense<0.000000e+00> : vector<128xf32>
    %48 = vector.multi_reduction <add>, %47, %cst_19 [0] : vector<128x128xf32> to vector<128xf32>
    %49 = vector.shape_cast %48 : vector<128xf32> to vector<1x128xf32>
    %cst_20 = arith.constant 3.125000e-02 : f32
    %50 = vector.broadcast %cst_20 : f32 to vector<1x128xf32>
    %51 = arith.mulf %49, %50 : vector<1x128xf32>
    %52 = vector.broadcast %51 : vector<1x128xf32> to vector<128x128xf32>
    %53 = arith.subf %45, %52 : vector<128x128xf32>
    %54 = arith.mulf %53, %53 : vector<128x128xf32>
    %55 = vector.broadcast %5 : vector<128x1xf32> to vector<128x128xf32>
    %56 = arith.mulf %54, %55 : vector<128x128xf32>
    %57 = vector.shape_cast %56 : vector<128x128xf32> to vector<1x128x128xf32>
    %cst_21 = arith.constant dense<0.000000e+00> : vector<1xf32>
    %58 = vector.multi_reduction <add>, %57, %cst_21 [1, 2] : vector<1x128x128xf32> to vector<1xf32>
    %59 = vector.shape_cast %58 : vector<1xf32> to vector<1x1x1xf32>
    %60 = vector.extract %59[0, 0, 0] : f32 from vector<1x1x1xf32>
    %61 = vector.broadcast %60 : f32 to vector<1x1xf32>
    %cst_22 = arith.constant 3.125000e-02 : f32
    %62 = vector.broadcast %cst_22 : f32 to vector<1x1xf32>
    %63 = arith.mulf %61, %62 : vector<1x1xf32>
    %cst_23 = arith.constant 9.99999974E-6 : f32
    %64 = vector.broadcast %cst_23 : f32 to vector<1x1xf32>
    %65 = arith.addf %64, %63 : vector<1x1xf32>
    %66 = math.rsqrt %65 : vector<1x1xf32>
    %67 = vector.broadcast %66 : vector<1x1xf32> to vector<128x128xf32>
    %68 = arith.mulf %53, %67 : vector<128x128xf32>
    %69 = math.tanh %68 : vector<128x128xf32>
    %70 = arith.truncf %69 : vector<128x128xf32> to vector<128x128xbf16>
    %c0_24 = arith.constant 0 : index
    %c0_25 = arith.constant 0 : index
    %71 = vector.load %arg7[%c0_24, %c0_25] : memref<128x128xbf16, #tpu.memory_space<vmem>>, vector<128x128xbf16>
    %cst_26 = arith.constant dense<0.000000e+00> : vector<128x128xf32>
    %72 = tpu.matmul %70, %71, %cst_26 {dimension_numbers = #tpu.dot_dimension_numbers<[1], [0], [0], [1], [0, 0, 1, 1], [], []>} : vector<128x128xbf16>, vector<128x128xbf16>, vector<128x128xf32> -> vector<128x128xf32>
    %73 = arith.truncf %72 : vector<128x128xf32> to vector<128x128xbf16>
    %cst_27 = arith.constant dense<0.000000e+00> : vector<128x128xf32>
    %74 = tpu.matmul %0, %73, %cst_27 {dimension_numbers = #tpu.dot_dimension_numbers<[1], [0], [0], [1], [0, 0, 1, 1], [], []>} : vector<128x128xbf16>, vector<128x128xbf16>, vector<128x128xf32> -> vector<128x128xf32>
    %c0_28 = arith.constant 0 : index
    %c0_29 = arith.constant 0 : index
    %75 = vector.load %arg8[%c0_28, %c0_29] : memref<1x128xf32, #tpu.memory_space<vmem>>, vector<1x128xf32>
    %76 = vector.broadcast %75 : vector<1x128xf32> to vector<128x128xf32>
    %77 = arith.addf %74, %76 : vector<128x128xf32>
    %78 = tpu.iota {dimensions = array<i32: 1>} : vector<128x128xi32>
    %c8_i32 = arith.constant 8 : i32
    %79 = vector.broadcast %c8_i32 : i32 to vector<128x128xi32>
    %80 = arith.cmpi slt, %78, %79 : vector<128x128xi32>
    %cst_30 = arith.constant -1.000000e+30 : f32
    %81 = vector.broadcast %cst_30 : f32 to vector<128x128xf32>
    %82 = arith.select %80, %77, %81 : vector<128x128xi1>, vector<128x128xf32>
    %cst_31 = arith.constant dense<0xFF800000> : vector<128xf32>
    %83 = vector.multi_reduction <maximumf>, %82, %cst_31 [1] : vector<128x128xf32> to vector<128xf32>
    %84 = vector.shape_cast %83 : vector<128xf32> to vector<128x1xf32>
    %85 = vector.broadcast %84 : vector<128x1xf32> to vector<128x128xf32>
    %86 = arith.subf %82, %85 : vector<128x128xf32>
    %87 = math.exp %86 : vector<128x128xf32>
    %cst_32 = arith.constant dense<0.000000e+00> : vector<128xf32>
    %88 = vector.multi_reduction <add>, %87, %cst_32 [1] : vector<128x128xf32> to vector<128xf32>
    %89 = vector.shape_cast %88 : vector<128xf32> to vector<128x1xf32>
    %90 = math.log %89 : vector<128x1xf32>
    %91 = arith.addf %90, %84 : vector<128x1xf32>
    %92 = vector.broadcast %91 : vector<128x1xf32> to vector<128x128xf32>
    %93 = arith.subf %82, %92 : vector<128x128xf32>
    %c0_33 = arith.constant 0 : index
    %c0_34 = arith.constant 0 : index
    %94 = vector.load %arg9[%c0_33, %c0_34] : memref<128x128xf32, #tpu.memory_space<vmem>>, vector<128x128xf32>
    tpu.vector_store %arg9[%c0_33, %c0_34], %93 {strides = array<i32>} : memref<128x128xf32, #tpu.memory_space<vmem>>, vector<128x128xf32>,
    return
  }
  func.func @transform_0(%arg0: i32) -> (i32, i32) {
    %c0_i32 = arith.constant 0 : i32
    %c0_i32_0 = arith.constant 0 : i32
    %c0_i32_1 = arith.constant 0 : i32
    return %c0_i32, %c0_i32_0 : i32, i32
  }
  func.func @transform_1(%arg0: i32) -> (i32, i32) {
    %c0_i32 = arith.constant 0 : i32
    %c0_i32_0 = arith.constant 0 : i32
    %c0_i32_1 = arith.constant 0 : i32
    return %c0_i32, %c0_i32_0 : i32, i32
  }
  func.func @transform_2(%arg0: i32) -> (i32, i32) {
    %c0_i32 = arith.constant 0 : i32
    %c0_i32_0 = arith.constant 0 : i32
    %c0_i32_1 = arith.constant 0 : i32
    return %c0_i32, %c0_i32_0 : i32, i32
  }
  func.func @transform_3(%arg0: i32) -> (i32, i32) {
    %c0_i32 = arith.constant 0 : i32
    %c0_i32_0 = arith.constant 0 : i32
    %c0_i32_1 = arith.constant 0 : i32
    return %c0_i32, %c0_i32_0 : i32, i32
  }
  func.func @transform_4(%arg0: i32) -> (i32, i32) {
    %c0_i32 = arith.constant 0 : i32
    %c0_i32_0 = arith.constant 0 : i32
    %c0_i32_1 = arith.constant 0 : i32
    return %c0_i32, %c0_i32_0 : i32, i32
  }
  func.func @transform_5(%arg0: i32) -> (i32, i32) {
    %c0_i32 = arith.constant 0 : i32
    %c0_i32_0 = arith.constant 0 : i32
    %c0_i32_1 = arith.constant 0 : i32
    return %c0_i32, %c0_i32_0 : i32, i32
  }
  func.func @transform_6(%arg0: i32) -> (i32, i32) {
    %c0_i32 = arith.constant 0 : i32
    %c0_i32_0 = arith.constant 0 : i32
    %c0_i32_1 = arith.constant 0 : i32
    return %c0_i32, %c0_i32_0 : i32, i32
  }
  func.func @transform_7(%arg0: i32) -> (i32, i32) {
    %c0_i32 = arith.constant 0 : i32
    %c0_i32_0 = arith.constant 0 : i32
    %c0_i32_1 = arith.constant 0 : i32
    return %c0_i32, %c0_i32_0 : i32, i32
  }
  func.func @transform_8(%arg0: i32) -> (i32, i32) {
    %c0_i32 = arith.constant 0 : i32
    %c0_i32_0 = arith.constant 0 : i32
    %c0_i32_1 = arith.constant 0 : i32
    return %c0_i32, %c0_i32_0 : i32, i32
  }
}

</mosaic_0001>

<bundles_post_ra>
// kernel: tpu_custom_call.1
= control target key start
LH: loop header
LB: loop body
LE: loop exit
PB: predicated region body
PF: predicated region fallthrough
CT: control target
= control target key end

     0   :  { %13 = vsyncpa [#allocation3], 0  ;;  %s2663_s0 = inlined_call_operand.vmem [shape: bf16[128,128], index: 0, kind: input, shape index: {}]   ;;  %s2664_s1 = inlined_call_operand.vmem [shape: bf16[128,16], index: 1, kind: input, shape index: {}]   ;;  %s2665_s2 = inlined_call_operand.vmem [shape: bf16[16,128], index: 2, kind: input, shape index: {}]   ;;  %s2666_s3 = inlined_call_operand.vmem [shape: f32[1,128], index: 3, kind: input, shape index: {}]   ;;  %s2667_s4 = inlined_call_operand.hbm [shape: bf16[128,128], index: 4, kind: input, shape index: {}]   ;;  %s2668_s5 = inlined_call_operand.vmem [shape: f32[1,128], index: 5, kind: input, shape index: {}]   ;;  %s2669_s6 = inlined_call_operand.hbm [shape: bf16[128,128], index: 6, kind: input, shape index: {}]   ;;  %s2670_s7 = inlined_call_operand.vmem [shape: f32[1,128], index: 7, kind: input, shape index: {}]   ;;  %s2671_s8 = inlined_call_operand.hbm [shape: f32[128,128], index: 8, kind: output, shape index: {}]  }
   0x1   :  { %14 = vsyncpa [#allocation6], 0 }
   0x2   :  { %15 = vsyncpa [#allocation4], 0  ;;  %s2145_s27 = smov [#allocation2]  }
   0x3   :  { %s29_s28 = sshll.u32 %s2145_s27, 4  ;;  %s30_s28 = int_to_ptr.vmem [resolvable:$true] %s29_s28 }
   0x4   :  { %s2087_s29 = scalar_lea.vmem %s30_s28, 1024  ;;  %p2092_p1 = scmp.lt.s32.totalorder %s30_s28, %s30_s28 }
   0x5   :  { %p2088_p0 = scmp.ne.s32.totalorder %s30_s28, %s2087_s29  ;;  %p2093_p2 = scmp.lt.s32.totalorder %s2087_s29, %s2087_s29 }
   0x7   :  { %p2094_p3 = por %p2093_p2, %p2092_p1 }
   0x9   :  { %p2095_p4 = pnand %p2094_p3, %p2088_p0 }
   0xb   :  { %2098 = shalt.err (!%p2095_p4)
}
   0xc   :  { %s2146_s30 = smov 64   ;;  %s2147_s9 = smov 4  }
   0xd   :  { %35 = dma.hbm_to_vmem [thread:$0]  %s2667_s4, 1024, %s30_s28, [#allocation3], %s2146_s30, %s2146_s30, %s2147_s9  }
   0xe   :  { %s2148_s12 = smov [#allocation5]  }
   0xf   :  { %s43_s13 = sshll.u32 %s2148_s12, 4  ;;  %s44_s13 = int_to_ptr.vmem [resolvable:$true] %s43_s13 }
  0x10   :  { %s2107_s14 = scalar_lea.vmem %s44_s13, 1024  ;;  %p2112_p6 = scmp.lt.s32.totalorder %s44_s13, %s44_s13 }
  0x11   :  { %p2108_p5 = scmp.ne.s32.totalorder %s44_s13, %s2107_s14  ;;  %p2113_p7 = scmp.lt.s32.totalorder %s2107_s14, %s2107_s14 }
  0x13   :  { %p2114_p8 = por %p2113_p7, %p2112_p6 }
  0x15   :  { %p2115_p9 = pnand %p2114_p8, %p2108_p5 }
  0x17   :  { %2118 = shalt.err (!%p2115_p9)
}
  0x18   :  { %49 = dma.hbm_to_vmem [thread:$0]  %s2669_s6, 1024, %s44_s13, [#allocation6], %s2146_s30, %s2146_s30, %s2147_s9  }
  0x19   :  { %2139 = dma.done.wait [#allocation3], 1024  }
  0x1a   :  { %2140 = vsyncadd [#allocation3], 4294966272 }
  0x1b   :  { %2141 = dma.done.wait [#allocation6], 1024  }
  0x1c   :  { %2142 = vsyncadd [#allocation6], 4294966272  ;;  %v1907_v0 = vld [vmem:[%s2665_s2] sm:$0xff]   ;;  %vm205_vm0 = vcmask 130048   ;;  %v1909_v2 = vld [vmem:[%s2664_s1 + $0x8] sm:$0xff]  }
  0x1d   :  { %v1908_v1 = vld [vmem:[%s2664_s1] sm:$0xff]   ;;  %1702 = vmatprep.subr.bf16.mxu0 %v1907_v0  ;;  %v1910_v3 = vld [vmem:[%s2664_s1 + $0x10] sm:$0xff]   ;;  %v1911_v4 = vld [vmem:[%s2664_s1 + $0x18] sm:$0xff]  }
  0x1e   :  { %1703 = vmatpush3.bf16.msra.mxu0 %v1907_v0  ;;  %1704 = vmatprep.mubr.msk.bf16.mxu0 %vm205_vm0, %v1908_v1  ;;  %v1912_v5 = vld [vmem:[%s2664_s1 + $0x20] sm:$0xff]   ;;  %v1913_v6 = vld [vmem:[%s2664_s1 + $0x28] sm:$0xff]   ;;  %v1914_v7 = vld [vmem:[%s2664_s1 + $0x30] sm:$0xff]  }
  0x1f   :  { %v1915_v8 = vld [vmem:[%s2664_s1 + $0x38] sm:$0xff]   ;;  %v1916_v9 = vld [vmem:[%s2663_s0] sm:$0xff]   ;;  %v2244_v34 = vld [vmem:[%s2663_s0 + $0x8] sm:$0xff]  }
  0x20   :  { %1736 = vmatprep.mubr.bf16.mxu1 %v1916_v9  ;;  %v2249_v35 = vld [vmem:[%s2663_s0 + $0x10] sm:$0xff]   ;;  %v2256_v36 = vld [vmem:[%s2663_s0 + $0x18] sm:$0xff]   ;;  %v2261_v37 = vld [vmem:[%s2663_s0 + $0x20] sm:$0xff]  }
  0x21   :  { %1705 = vmatmul.mubr.msk.bf16.vlgmr.msra.gmra.mxu0 %vm205_vm0, %v1909_v2  ;;  %v2268_v38 = vld [vmem:[%s2663_s0 + $0x28] sm:$0xff]   ;;  %v2273_v39 = vld [vmem:[%s2663_s0 + $0x30] sm:$0xff]   ;;  %v2280_v40 = vld [vmem:[%s2663_s0 + $0x38] sm:$0xff]  }
  0x22   :  { %1708 = vmatprep.mubr.msk.bf16.mxu0 %vm205_vm0, %v1910_v3  ;;  %v1586_v44 = vld [vmem:[%s2666_s3] ss:$0 sm:$0xff] }
  0x29   :  { %1709 = vmatmul.mubr.msk.bf16.gmra.mxu0 %vm205_vm0, %v1911_v4 }
  0x2a   :  { %1712 = vmatprep.mubr.msk.bf16.mxu0 %vm205_vm0, %v1912_v5 }
  0x31   :  { %1713 = vmatmul.mubr.msk.bf16.gmra.mxu0 %vm205_vm0, %v1913_v6 }
  0x32   :  { %1716 = vmatprep.mubr.msk.bf16.mxu0 %vm205_vm0, %v1914_v7 }
  0x39   :  { %1717 = vmatmul.mubr.msk.bf16.gmra.mxu0 %vm205_vm0, %v1915_v8 }
  0xe1   :  { %v1706_v10 = vpop.f32.mrf.mxu0 }
  0xe3   :  { %v264_v11 = vpop.f32.mrf.mxu0 }
  0xe5   :  { %v1707_v12 = vpop.f32.mrf.mxu0 }
  0xe6   :  { %v328_v32 = vpack.c.bf16 %v1707_v12, %v1706_v10 }
  0xe7   :  { %v267_v13 = vpop.f32.mrf.mxu0 }
  0xe8   :  { %v327_v33 = vpack.c.bf16 %v267_v13, %v264_v11 }
  0xe9   :  { %v1710_v14 = vpop.f32.mrf.mxu0 }
  0xeb   :  { %v280_v15 = vpop.f32.mrf.mxu0 }
  0xed   :  { %v1711_v16 = vpop.f32.mrf.mxu0 }
  0xee   :  { %v330_v30 = vpack.c.bf16 %v1711_v16, %v1710_v14 }
  0xef   :  { %v283_v17 = vpop.f32.mrf.mxu0 }
  0xf0   :  { %v329_v31 = vpack.c.bf16 %v283_v17, %v280_v15 }
  0xf1   :  { %v1714_v18 = vpop.f32.mrf.mxu0 }
  0xf3   :  { %v296_v19 = vpop.f32.mrf.mxu0 }
  0xf5   :  { %v1715_v20 = vpop.f32.mrf.mxu0 }
  0xf6   :  { %v332_v28 = vpack.c.bf16 %v1715_v20, %v1714_v18 }
  0xf7   :  { %v299_v21 = vpop.f32.mrf.mxu0 }
  0xf8   :  { %v331_v29 = vpack.c.bf16 %v299_v21, %v296_v19 }
  0xf9   :  { %v1718_v22 = vpop.f32.mrf.mxu0 }
  0xfb   :  { %v312_v23 = vpop.f32.mrf.mxu0 }
  0xfd   :  { %v1719_v24 = vpop.f32.mrf.mxu0 }
  0xfe   :  { %v334_v25 = vpack.c.bf16 %v1719_v24, %v1718_v22 }
  0xff   :  { %v315_v26 = vpop.f32.mrf.mxu0 }
 0x100   :  { %v333_v27 = vpack.c.bf16 %v315_v26, %v312_v23  ;;  %1720 = vmatprep.subr.bf16.mxu1 %v334_v25 }
 0x101   :  { %1721 = vmatpush3.bf16.msra.mxu1 %v334_v25 }
 0x102   :  { %1722 = vmatprep.subr.bf16.mxu1 %v333_v27 }
 0x105   :  { %1723 = vmatpush3.bf16.msra.mxu1 %v333_v27 }
 0x106   :  { %1724 = vmatprep.subr.bf16.mxu1 %v332_v28 }
 0x109   :  { %1725 = vmatpush3.bf16.msra.mxu1 %v332_v28 }
 0x10a   :  { %1726 = vmatprep.subr.bf16.mxu1 %v331_v29 }
 0x10d   :  { %1727 = vmatpush3.bf16.msra.mxu1 %v331_v29 }
 0x10e   :  { %1728 = vmatprep.subr.bf16.mxu1 %v330_v30 }
 0x111   :  { %1729 = vmatpush3.bf16.msra.mxu1 %v330_v30 }
 0x112   :  { %1730 = vmatprep.subr.bf16.mxu1 %v329_v31 }
 0x115   :  { %1731 = vmatpush3.bf16.msra.mxu1 %v329_v31 }
 0x116   :  { %1732 = vmatprep.subr.bf16.mxu1 %v328_v32 }
 0x119   :  { %1733 = vmatpush3.bf16.msra.mxu1 %v328_v32 }
 0x11a   :  { %1734 = vmatprep.subr.bf16.mxu1 %v327_v33 }
 0x11d   :  { %1735 = vmatpush3.bf16.msra.mxu1 %v327_v33 }
 0x120   :  { %1737 = vmatmul.mubr.bf16.vlgmr.msra.gmra.mxu1 %v2244_v34 }
 0x121   :  { %1740 = vmatprep.mubr.bf16.mxu1 %v2249_v35 }
 0x128   :  { %1741 = vmatmul.mubr.bf16.gmra.mxu1 %v2256_v36 }
 0x129   :  { %1744 = vmatprep.mubr.bf16.mxu1 %v2261_v37 }
 0x130   :  { %1745 = vmatmul.mubr.bf16.gmra.mxu1 %v2268_v38 }
 0x131   :  { %1748 = vmatprep.mubr.bf16.mxu1 %v2273_v39 }
 0x138   :  { %1749 = vmatmul.mubr.bf16.gmra.mxu1 %v2280_v40 }
 0x139   :  { %1800 = vmatprep.mubr.bf16.mxu1 %v1916_v9 }
 0x1e0   :  { %v1738_v41 = vpop.f32.mrf.mxu1 }
 0x1e1   :  { %v432_v49 = vadd.f32 %v1738_v41, %v1586_v44 }
 0x1e2   :  { %v423_v42 = vpop.f32.mrf.mxu1 }
 0x1e3   :  { %v424_v46 = vadd.f32 %v1586_v44, %v423_v42 }
 0x1e4   :  { %v1739_v43 = vpop.f32.mrf.mxu1 }
 0x1e5   :  { %v435_v52 = vadd.f32 %v1739_v43, %v1586_v44 }
 0x1e6   :  { %v426_v45 = vpop.f32.mrf.mxu1 }
 0x1e7   :  { %v427_v47 = vadd.f32 %v1586_v44, %v426_v45 }
 0x1e8   :  { %v1742_v48 = vpop.f32.mrf.mxu1 }
 0x1e9   :  { %v502_v50 = vadd.f32 %v427_v47, %v424_v46  ;;  %v448_v59 = vadd.f32 %v1742_v48, %v1586_v44 }
 0x1ea   :  { %v439_v51 = vpop.f32.mrf.mxu1 }
 0x1eb   :  { %v503_v53 = vadd.f32 %v502_v50, %v432_v49  ;;  %v440_v54 = vadd.f32 %v1586_v44, %v439_v51  ;;  %v492_v2 = vmul.f32 0.0, %v448_v59 }
 0x1ec   :  { %v1743_v55 = vpop.f32.mrf.mxu1 }
 0x1ed   :  { %v490_v56 = vmul.f32 0.0, %v440_v54  ;;  %v504_v57 = vadd.f32 %v503_v53, %v435_v52  ;;  %v451_v63 = vadd.f32 %v1743_v55, %v1586_v44 }
 0x1ee   :  { %v442_v58 = vpop.f32.mrf.mxu1 }
 0x1ef   :  { %v443_v60 = vadd.f32 %v1586_v44, %v442_v58  ;;  %v505_v62 = vadd.f32 %v504_v57, %v490_v56  ;;  %v493_v6 = vmul.f32 0.0, %v451_v63 }
 0x1f0   :  { %v1746_v61 = vpop.f32.mrf.mxu1 }
 0x1f1   :  { %v491_v0 = vmul.f32 0.0, %v443_v60  ;;  %v464_v9 = vadd.f32 %v1746_v61, %v1586_v44 }
 0x1f2   :  { %v455_v1 = vpop.f32.mrf.mxu1 }
 0x1f3   :  { %v506_v3 = vadd.f32 %v505_v62, %v491_v0  ;;  %v456_v4 = vadd.f32 %v1586_v44, %v455_v1  ;;  %v496_v18 = vmul.f32 0.0, %v464_v9 }
 0x1f4   :  { %v1747_v5 = vpop.f32.mrf.mxu1 }
 0x1f5   :  { %v507_v7 = vadd.f32 %v506_v3, %v492_v2  ;;  %v494_v10 = vmul.f32 0.0, %v456_v4  ;;  %v467_v15 = vadd.f32 %v1747_v5, %v1586_v44 }
 0x1f6   :  { %v458_v8 = vpop.f32.mrf.mxu1 }
 0x1f7   :  { %v508_v11 = vadd.f32 %v507_v7, %v493_v6  ;;  %v459_v12 = vadd.f32 %v1586_v44, %v458_v8  ;;  %v497_v22 = vmul.f32 0.0, %v467_v15 }
 0x1f8   :  { %v1750_v13 = vpop.f32.mrf.mxu1 }
 0x1f9   :  { %v509_v14 = vadd.f32 %v508_v11, %v494_v10  ;;  %v495_v16 = vmul.f32 0.0, %v459_v12  ;;  %v480_v25 = vadd.f32 %v1750_v13, %v1586_v44 }
 0x1fa   :  { %v471_v17 = vpop.f32.mrf.mxu1 }
 0x1fb   :  { %v510_v19 = vadd.f32 %v509_v14, %v495_v16  ;;  %v472_v20 = vadd.f32 %v1586_v44, %v471_v17  ;;  %v500_v32 = vmul.f32 0.0, %v480_v25 }
 0x1fc   :  { %v1751_v21 = vpop.f32.mrf.mxu1 }
 0x1fd   :  { %v511_v23 = vadd.f32 %v510_v19, %v496_v18  ;;  %v498_v26 = vmul.f32 0.0, %v472_v20  ;;  %v483_v30 = vadd.f32 %v1751_v21, %v1586_v44 }
 0x1fe   :  { %v474_v24 = vpop.f32.mrf.mxu1 }
 0x1ff   :  { %v512_v27 = vadd.f32 %v511_v23, %v497_v22  ;;  %v475_v28 = vadd.f32 %v1586_v44, %v474_v24  ;;  %v501_v41 = vmul.f32 0.0, %v483_v30 }
 0x201   :  { %v513_v29 = vadd.f32 %v512_v27, %v498_v26  ;;  %v499_v31 = vmul.f32 0.0, %v475_v28 }
 0x203   :  { %v514_v33 = vadd.f32 %v513_v29, %v499_v31 }
 0x205   :  { %v515_v42 = vadd.f32 %v514_v33, %v500_v32 }
 0x207   :  { %v516_v43 = vadd.f32 %v515_v42, %v501_v41 }
 0x209   :  { %v517_v45 = vrot.slane %v516_v43, 4 }
 0x20b   :  { %v518_v48 = vadd.f32 %v517_v45, %v516_v43 }
 0x20d   :  { %v519_v50 = vrot.slane %v518_v48, 2 }
 0x20f   :  { %v520_v51 = vadd.f32 %v519_v50, %v518_v48 }
 0x211   :  { %v521_v53 = vrot.slane %v520_v51, 1 }
 0x213   :  { %v522_v55 = vadd.f32 %v521_v53, %v520_v51 }
 0x215   :  { %v523_v56 = vmul.f32 0.03125, %v522_v55 }
 0x217   :  { %v2286_v57 = vsub.f32 %v424_v46, %v523_v56  ;;  %v2288_v58 = vsub.f32 %v427_v47, %v523_v56  ;;  %v2290_v61 = vsub.f32 %v432_v49, %v523_v56  ;;  %v2292_v44 = vsub.f32 %v440_v54, %v523_v56 }
 0x218   :  { %v2298_v1 = vsub.f32 %v435_v52, %v523_v56  ;;  %v2300_v2 = vsub.f32 %v443_v60, %v523_v56  ;;  %v2302_v3 = vsub.f32 %v448_v59, %v523_v56  ;;  %v2308_v54 = vsub.f32 %v451_v63, %v523_v56 }
 0x219   :  { %v540_v62 = vmul.f32 %v2286_v57, %v2286_v57  ;;  %v541_v0 = vmul.f32 %v2288_v58, %v2288_v58  ;;  %v542_v46 = vmul.f32 %v2290_v61, %v2290_v61  ;;  %v544_v47 = vmul.f32 %v2292_v44, %v2292_v44 }
 0x21a   :  { %v543_v5 = vmul.f32 %v2298_v1, %v2298_v1  ;;  %v545_v52 = vmul.f32 %v2300_v2, %v2300_v2  ;;  %v2314_v60 = vsub.f32 %v456_v4, %v523_v56  ;;  %v546_v59 = vmul.f32 %v2302_v3, %v2302_v3 }
 0x21b   :  { %v572_v49 = vadd.f32 %v541_v0, %v540_v62  ;;  %v560_v7 = vmul.f32 0.0, %v544_v47  ;;  %v2318_v10 = vsub.f32 %v459_v12, %v523_v56  ;;  %v547_v63 = vmul.f32 %v2308_v54, %v2308_v54 }
 0x21c   :  { %v561_v11 = vmul.f32 0.0, %v545_v52  ;;  %v2322_v14 = vsub.f32 %v464_v9, %v523_v56  ;;  %v548_v16 = vmul.f32 %v2314_v60, %v2314_v60  ;;  %v562_v17 = vmul.f32 0.0, %v546_v59  ;;  %v1928_v52 = vld [vmem:[#allocation2 + $0x18] sm:$0xff]   ;;  %v1930_v59 = vld [vmem:[#allocation2 + $0x8] sm:$0xff]  }
 0x21d   :  { %v573_v6 = vadd.f32 %v572_v49, %v542_v46  ;;  %v2326_v18 = vsub.f32 %v467_v15, %v523_v56  ;;  %v549_v19 = vmul.f32 %v2318_v10, %v2318_v10  ;;  %v563_v21 = vmul.f32 0.0, %v547_v63  ;;  %v1926_v49 = vld [vmem:[#allocation2 + $0x28] sm:$0xff]  }
 0x21e   :  { %v2330_v22 = vsub.f32 %v472_v20, %v523_v56  ;;  %v550_v23 = vmul.f32 %v2322_v14, %v2322_v14  ;;  %v564_v24 = vmul.f32 0.0, %v548_v16  ;;  %v2334_v26 = vsub.f32 %v475_v28, %v523_v56 }
 0x21f   :  { %v574_v8 = vadd.f32 %v573_v6, %v543_v5  ;;  %v551_v27 = vmul.f32 %v2326_v18, %v2326_v18  ;;  %v565_v29 = vmul.f32 0.0, %v549_v19  ;;  %v2338_v31 = vsub.f32 %v480_v25, %v523_v56  ;;  %v1927_v5 = vld [vmem:[#allocation2 + $0x20] sm:$0xff]   ;;  %v1929_v6 = vld [vmem:[#allocation2 + $0x10] sm:$0xff]  }
 0x220   :  { %v552_v32 = vmul.f32 %v2330_v22, %v2330_v22  ;;  %v566_v33 = vmul.f32 0.0, %v550_v23  ;;  %v553_v41 = vmul.f32 %v2334_v26, %v2334_v26  ;;  %v2344_v42 = vsub.f32 %v483_v30, %v523_v56  ;;  %v1924_v30 = vld [vmem:[#allocation2 + $0x38] sm:$0xff]   ;;  %v1925_v56 = vld [vmem:[#allocation2 + $0x30] sm:$0xff]  }
 0x221   :  { %v575_v13 = vadd.f32 %v574_v8, %v560_v7  ;;  %v567_v43 = vmul.f32 0.0, %v551_v27  ;;  %v554_v45 = vmul.f32 %v2338_v31, %v2338_v31  ;;  %1752 = vmatprep.subr.bf16.mxu0 %v1924_v30  ;;  %v1931_v7 = vld [vmem:[#allocation2] sm:$0xff]  }
 0x222   :  { %v568_v48 = vmul.f32 0.0, %v552_v32  ;;  %v569_v51 = vmul.f32 0.0, %v553_v41  ;;  %v555_v25 = vmul.f32 %v2344_v42, %v2344_v42  ;;  %1753 = vmatpush3.bf16.msra.mxu0 %v1924_v30 }
 0x223   :  { %v576_v4 = vadd.f32 %v575_v13, %v561_v11  ;;  %v570_v55 = vmul.f32 0.0, %v554_v45  ;;  %1754 = vmatprep.subr.bf16.mxu0 %v1925_v56 }
 0x224   :  { %v571_v0 = vmul.f32 0.0, %v555_v25 }
 0x225   :  { %v577_v12 = vadd.f32 %v576_v4, %v562_v17 }
 0x226   :  { %1755 = vmatpush3.bf16.msra.mxu0 %v1925_v56 }
 0x227   :  { %v578_v9 = vadd.f32 %v577_v12, %v563_v21  ;;  %1756 = vmatprep.subr.bf16.mxu0 %v1926_v49 }
 0x229   :  { %v579_v15 = vadd.f32 %v578_v9, %v564_v24 }
 0x22a   :  { %1757 = vmatpush3.bf16.msra.mxu0 %v1926_v49 }
 0x22b   :  { %v580_v20 = vadd.f32 %v579_v15, %v565_v29  ;;  %1758 = vmatprep.subr.bf16.mxu0 %v1927_v5 }
 0x22d   :  { %v581_v28 = vadd.f32 %v580_v20, %v566_v33 }
 0x22e   :  { %1759 = vmatpush3.bf16.msra.mxu0 %v1927_v5 }
 0x22f   :  { %v582_v50 = vadd.f32 %v581_v28, %v567_v43  ;;  %1760 = vmatprep.subr.bf16.mxu0 %v1928_v52 }
 0x231   :  { %v583_v53 = vadd.f32 %v582_v50, %v568_v48 }
 0x232   :  { %1761 = vmatpush3.bf16.msra.mxu0 %v1928_v52 }
 0x233   :  { %v584_v62 = vadd.f32 %v583_v53, %v569_v51  ;;  %1762 = vmatprep.subr.bf16.mxu0 %v1929_v6 }
 0x235   :  { %v585_v46 = vadd.f32 %v584_v62, %v570_v55 }
 0x236   :  { %1763 = vmatpush3.bf16.msra.mxu0 %v1929_v6 }
 0x237   :  { %v586_v47 = vadd.f32 %v585_v46, %v571_v0  ;;  %1764 = vmatprep.subr.bf16.mxu0 %v1930_v59 }
 0x239   :  { %587 = vadd.xlane.f32.xlu0 %v586_v47 }
 0x23a   :  { %1765 = vmatpush3.bf16.msra.mxu0 %v1930_v59 }
 0x23b   :  { %1766 = vmatprep.subr.bf16.mxu0 %v1931_v7 }
 0x23e   :  { %1767 = vmatpush3.bf16.msra.mxu0 %v1931_v7 }
 0x2c2   :  { %v588_v8 = vpop.xlane.xlu0 %587 }
 0x2c3   :  { %v589_v63 = vrot.slane %v588_v8, 4 }
 0x2c5   :  { %v590_v11 = vadd.f32 %v589_v63, %v588_v8 }
 0x2c7   :  { %v591_v13 = vrot.slane %v590_v11, 2 }
 0x2c9   :  { %v592_v16 = vadd.f32 %v591_v13, %v590_v11 }
 0x2cb   :  { %v593_v17 = vrot.slane %v592_v16, 1 }
 0x2cd   :  { %v594_v4 = vadd.f32 %v593_v17, %v592_v16 }
 0x2cf   :  { %1896 = vpush %v594_v4 }
 0x300   :  { %s1897_s3 = spop %1896 }
 0x301   :  { %v596_v19 = vstv %s1897_s3 }
 0x302   :  { %v597_v21 = vmul.f32 0.03125, %v596_v19 }
 0x304   :  { %v598_v12 = vadd.f32 1e-05, %v597_v21 }
 0x306   :  { %1940 = vrsqrt.f32 %v598_v12 }
 0x313   :  { %v1941_v23 = vpop.eup %1940 }
 0x314   :  { %v600_v24 = vmul.f32 %v1941_v23, %v2286_v57  ;;  %v601_v9 = vmul.f32 %v1941_v23, %v2288_v58  ;;  %v602_v27 = vmul.f32 %v1941_v23, %v2290_v61  ;;  %v603_v29 = vmul.f32 %v1941_v23, %v2298_v1 }
 0x315   :  { %v604_v15 = vmul.f32 %v1941_v23, %v2292_v44  ;;  %v605_v32 = vmul.f32 %v1941_v23, %v2300_v2  ;;  %v606_v33 = vmul.f32 %v1941_v23, %v2302_v3  ;;  %v607_v20 = vmul.f32 %v1941_v23, %v2308_v54 }
 0x316   :  { %1942 = vtanh.f32 %v600_v24  ;;  %v608_v57 = vmul.f32 %v1941_v23, %v2314_v60  ;;  %v609_v58 = vmul.f32 %v1941_v23, %v2318_v10  ;;  %v610_v61 = vmul.f32 %v1941_v23, %v2322_v14 }
 0x317   :  { %1944 = vtanh.f32 %v601_v9  ;;  %v611_v44 = vmul.f32 %v1941_v23, %v2326_v18  ;;  %v612_v2 = vmul.f32 %v1941_v23, %v2330_v22  ;;  %v613_v41 = vmul.f32 %v1941_v23, %v2334_v26 }
 0x318   :  { %1946 = vtanh.f32 %v602_v27  ;;  %v614_v48 = vmul.f32 %v1941_v23, %v2338_v31  ;;  %v615_v26 = vmul.f32 %v1941_v23, %v2344_v42 }
 0x319   :  { %1948 = vtanh.f32 %v603_v29 }
 0x31a   :  { %1950 = vtanh.f32 %v604_v15 }
 0x31b   :  { %1952 = vtanh.f32 %v605_v32 }
 0x31c   :  { %1954 = vtanh.f32 %v606_v33 }
 0x31d   :  { %1956 = vtanh.f32 %v607_v20 }
 0x31e   :  { %1958 = vtanh.f32 %v608_v57 }
 0x31f   :  { %1960 = vtanh.f32 %v609_v58 }
 0x320   :  { %1962 = vtanh.f32 %v610_v61 }
 0x321   :  { %1964 = vtanh.f32 %v611_v44 }
 0x322   :  { %1966 = vtanh.f32 %v612_v2 }
 0x323   :  { %v1943_v1 = vpop.eup %1942  ;;  %1968 = vtanh.f32 %v613_v41 }
 0x324   :  { %v1945_v3 = vpop.eup %1944  ;;  %1970 = vtanh.f32 %v614_v48 }
 0x325   :  { %v1947_v54 = vpop.eup %1946  ;;  %v632_v43 = vpack.c.bf16 %v1945_v3, %v1943_v1  ;;  %1972 = vtanh.f32 %v615_v26 }
 0x326   :  { %v1949_v60 = vpop.eup %1948 }
 0x327   :  { %v1951_v10 = vpop.eup %1950  ;;  %1768 = vmatprep.mubr.bf16.mxu0 %v632_v43  ;;  %v633_v28 = vpack.c.bf16 %v1949_v60, %v1947_v54 }
 0x328   :  { %v1953_v45 = vpop.eup %1952 }
 0x329   :  { %1769 = vmatmul.mubr.bf16.vlgmr.msra.gmra.mxu0 %v633_v28  ;;  %v634_v14 = vpack.c.bf16 %v1953_v45, %v1951_v10  ;;  %v1955_v18 = vpop.eup %1954 }
 0x32a   :  { %v1957_v22 = vpop.eup %1956 }
 0x32b   :  { %1772 = vmatprep.mubr.bf16.mxu0 %v634_v14  ;;  %v1959_v50 = vpop.eup %1958  ;;  %v635_v25 = vpack.c.bf16 %v1957_v22, %v1955_v18 }
 0x32c   :  { %v1961_v51 = vpop.eup %1960 }
 0x32d   :  { %v636_v53 = vpack.c.bf16 %v1961_v51, %v1959_v50  ;;  %v1963_v55 = vpop.eup %1962 }
 0x32e   :  { %v1965_v62 = vpop.eup %1964 }
 0x32f   :  { %v1967_v0 = vpop.eup %1966  ;;  %v637_v47 = vpack.c.bf16 %v1965_v62, %v1963_v55 }
 0x330   :  { %v1969_v46 = vpop.eup %1968 }
 0x331   :  { %1773 = vmatmul.mubr.bf16.gmra.mxu0 %v635_v25  ;;  %v638_v30 = vpack.c.bf16 %v1969_v46, %v1967_v0  ;;  %v1971_v31 = vpop.eup %1970 }
 0x332   :  { %1776 = vmatprep.mubr.bf16.mxu0 %v636_v53  ;;  %v1973_v56 = vpop.eup %1972 }
 0x333   :  { %v639_v49 = vpack.c.bf16 %v1973_v56, %v1971_v31 }
 0x339   :  { %1777 = vmatmul.mubr.bf16.gmra.mxu0 %v637_v47 }
 0x33a   :  { %1780 = vmatprep.mubr.bf16.mxu0 %v638_v30 }
 0x341   :  { %1781 = vmatmul.mubr.bf16.gmra.mxu0 %v639_v49 }
 0x3e9   :  { %v1770_v42 = vpop.f32.mrf.mxu0 }
 0x3eb   :  { %v739_v5 = vpop.f32.mrf.mxu0 }
 0x3ed   :  { %v1771_v52 = vpop.f32.mrf.mxu0 }
 0x3ee   :  { %v803_v32 = vpack.c.bf16 %v1771_v52, %v1770_v42 }
 0x3ef   :  { %v742_v6 = vpop.f32.mrf.mxu0 }
 0x3f0   :  { %v802_v33 = vpack.c.bf16 %v742_v6, %v739_v5 }
 0x3f1   :  { %v1774_v59 = vpop.f32.mrf.mxu0 }
 0x3f3   :  { %v755_v7 = vpop.f32.mrf.mxu0 }
 0x3f5   :  { %v1775_v8 = vpop.f32.mrf.mxu0 }
 0x3f6   :  { %v805_v29 = vpack.c.bf16 %v1775_v8, %v1774_v59 }
 0x3f7   :  { %v758_v63 = vpop.f32.mrf.mxu0 }
 0x3f8   :  { %v804_v15 = vpack.c.bf16 %v758_v63, %v755_v7 }
 0x3f9   :  { %v1778_v11 = vpop.f32.mrf.mxu0 }
 0x3fb   :  { %v771_v13 = vpop.f32.mrf.mxu0 }
 0x3fd   :  { %v1779_v16 = vpop.f32.mrf.mxu0 }
 0x3fe   :  { %v807_v9 = vpack.c.bf16 %v1779_v16, %v1778_v11 }
 0x3ff   :  { %v774_v17 = vpop.f32.mrf.mxu0 }
 0x400   :  { %v806_v27 = vpack.c.bf16 %v774_v17, %v771_v13 }
 0x401   :  { %v1782_v4 = vpop.f32.mrf.mxu0 }
 0x403   :  { %v787_v19 = vpop.f32.mrf.mxu0 }
 0x405   :  { %v1783_v21 = vpop.f32.mrf.mxu0 }
 0x406   :  { %v809_v12 = vpack.c.bf16 %v1783_v21, %v1782_v4 }
 0x407   :  { %v790_v23 = vpop.f32.mrf.mxu0 }
 0x408   :  { %v808_v24 = vpack.c.bf16 %v790_v23, %v787_v19  ;;  %1784 = vmatprep.subr.bf16.mxu1 %v809_v12 }
 0x409   :  { %1785 = vmatpush3.bf16.msra.mxu1 %v809_v12 }
 0x40a   :  { %1786 = vmatprep.subr.bf16.mxu1 %v808_v24 }
 0x40d   :  { %1787 = vmatpush3.bf16.msra.mxu1 %v808_v24 }
 0x40e   :  { %1788 = vmatprep.subr.bf16.mxu1 %v807_v9 }
 0x411   :  { %1789 = vmatpush3.bf16.msra.mxu1 %v807_v9 }
 0x412   :  { %1790 = vmatprep.subr.bf16.mxu1 %v806_v27 }
 0x415   :  { %1791 = vmatpush3.bf16.msra.mxu1 %v806_v27 }
 0x416   :  { %1792 = vmatprep.subr.bf16.mxu1 %v805_v29 }
 0x419   :  { %1793 = vmatpush3.bf16.msra.mxu1 %v805_v29 }
 0x41a   :  { %1794 = vmatprep.subr.bf16.mxu1 %v804_v15 }
 0x41d   :  { %1795 = vmatpush3.bf16.msra.mxu1 %v804_v15 }
 0x41e   :  { %1796 = vmatprep.subr.bf16.mxu1 %v803_v32 }
 0x421   :  { %1797 = vmatpush3.bf16.msra.mxu1 %v803_v32 }
 0x422   :  { %1798 = vmatprep.subr.bf16.mxu1 %v802_v33 }
 0x425   :  { %1799 = vmatpush3.bf16.msra.mxu1 %v802_v33 }
 0x428   :  { %1801 = vmatmul.mubr.bf16.vlgmr.msra.gmra.mxu1 %v2244_v34  ;;  %v1603_v34 = vld [vmem:[%s2668_s5] ss:$0 sm:$0xff] }
 0x429   :  { %1804 = vmatprep.mubr.bf16.mxu1 %v2249_v35 }
 0x430   :  { %1805 = vmatmul.mubr.bf16.gmra.mxu1 %v2256_v36 }
 0x431   :  { %1808 = vmatprep.mubr.bf16.mxu1 %v2261_v37 }
 0x438   :  { %1809 = vmatmul.mubr.bf16.gmra.mxu1 %v2268_v38 }
 0x439   :  { %1812 = vmatprep.mubr.bf16.mxu1 %v2273_v39 }
 0x440   :  { %1813 = vmatmul.mubr.bf16.gmra.mxu1 %v2280_v40 }
 0x441   :  { %1868 = vmatprep.mubr.bf16.mxu1 %v2249_v35 }
 0x4e8   :  { %v1802_v20 = vpop.f32.mrf.mxu1 }
 0x4e9   :  { %v859_v37 = vadd.f32 %v1802_v20, %v1603_v34 }
 0x4ea   :  { %v850_v57 = vpop.f32.mrf.mxu1 }
 0x4eb   :  { %v851_v44 = vadd.f32 %v1603_v34, %v850_v57 }
 0x4ec   :  { %v1803_v58 = vpop.f32.mrf.mxu1 }
 0x4ed   :  { %v862_v3 = vadd.f32 %v1803_v58, %v1603_v34 }
 0x4ee   :  { %v853_v61 = vpop.f32.mrf.mxu1 }
 0x4ef   :  { %v854_v36 = vadd.f32 %v1603_v34, %v853_v61 }
 0x4f0   :  { %v1806_v1 = vpop.f32.mrf.mxu1 }
 0x4f1   :  { %v929_v2 = vadd.f32 %v854_v36, %v851_v44  ;;  %v875_v60 = vadd.f32 %v1806_v1, %v1603_v34 }
 0x4f2   :  { %v866_v38 = vpop.f32.mrf.mxu1 }
 0x4f3   :  { %v930_v39 = vadd.f32 %v929_v2, %v859_v37  ;;  %v867_v41 = vadd.f32 %v1603_v34, %v866_v38  ;;  %v919_v22 = vmul.f32 0.0, %v875_v60 }
 0x4f4   :  { %v1807_v40 = vpop.f32.mrf.mxu1 }
 0x4f5   :  { %v917_v54 = vmul.f32 0.0, %v867_v41  ;;  %v931_v35 = vadd.f32 %v930_v39, %v862_v3  ;;  %v878_v14 = vadd.f32 %v1807_v40, %v1603_v34 }
 0x4f6   :  { %v869_v43 = vpop.f32.mrf.mxu1 }
 0x4f7   :  { %v870_v10 = vadd.f32 %v1603_v34, %v869_v43  ;;  %v932_v45 = vadd.f32 %v931_v35, %v917_v54  ;;  %v920_v25 = vmul.f32 0.0, %v878_v14 }
 0x4f8   :  { %v1810_v28 = vpop.f32.mrf.mxu1 }
 0x4f9   :  { %v918_v18 = vmul.f32 0.0, %v870_v10  ;;  %v891_v62 = vadd.f32 %v1810_v28, %v1603_v34 }
 0x4fa   :  { %v882_v48 = vpop.f32.mrf.mxu1 }
 0x4fb   :  { %v933_v26 = vadd.f32 %v932_v45, %v918_v18  ;;  %v883_v50 = vadd.f32 %v1603_v34, %v882_v48  ;;  %v923_v5 = vmul.f32 0.0, %v891_v62 }
 0x4fc   :  { %v1811_v51 = vpop.f32.mrf.mxu1 }
 0x4fd   :  { %v934_v53 = vadd.f32 %v933_v26, %v919_v22  ;;  %v921_v0 = vmul.f32 0.0, %v883_v50  ;;  %v894_v56 = vadd.f32 %v1811_v51, %v1603_v34 }
 0x4fe   :  { %v885_v55 = vpop.f32.mrf.mxu1 }
 0x4ff   :  { %v935_v46 = vadd.f32 %v934_v53, %v920_v25  ;;  %v886_v47 = vadd.f32 %v1603_v34, %v885_v55  ;;  %v924_v7 = vmul.f32 0.0, %v894_v56 }
 0x500   :  { %v1814_v30 = vpop.f32.mrf.mxu1 }
 0x501   :  { %v936_v31 = vadd.f32 %v935_v46, %v921_v0  ;;  %v922_v49 = vmul.f32 0.0, %v886_v47  ;;  %v907_v11 = vadd.f32 %v1814_v30, %v1603_v34 }
 0x502   :  { %v898_v42 = vpop.f32.mrf.mxu1 }
 0x503   :  { %v937_v52 = vadd.f32 %v936_v31, %v922_v49  ;;  %v899_v6 = vadd.f32 %v1603_v34, %v898_v42  ;;  %v927_v12 = vmul.f32 0.0, %v907_v11 }
 0x504   :  { %v1815_v59 = vpop.f32.mrf.mxu1 }
 0x505   :  { %v938_v8 = vadd.f32 %v937_v52, %v923_v5  ;;  %v925_v13 = vmul.f32 0.0, %v899_v6  ;;  %v910_v19 = vadd.f32 %v1815_v59, %v1603_v34 }
 0x506   :  { %v901_v63 = vpop.f32.mrf.mxu1 }
 0x507   :  { %v939_v16 = vadd.f32 %v938_v8, %v924_v7  ;;  %v902_v17 = vadd.f32 %v1603_v34, %v901_v63  ;;  %v928_v24 = vmul.f32 0.0, %v910_v19 }
 0x509   :  { %v940_v4 = vadd.f32 %v939_v16, %v925_v13  ;;  %v926_v21 = vmul.f32 0.0, %v902_v17 }
 0x50b   :  { %v941_v23 = vadd.f32 %v940_v4, %v926_v21 }
 0x50d   :  { %v942_v9 = vadd.f32 %v941_v23, %v927_v12 }
 0x50f   :  { %v943_v27 = vadd.f32 %v942_v9, %v928_v24 }
 0x511   :  { %v944_v29 = vrot.slane %v943_v27, 4 }
 0x513   :  { %v945_v15 = vadd.f32 %v944_v29, %v943_v27 }
 0x515   :  { %v946_v32 = vrot.slane %v945_v15, 2 }
 0x517   :  { %v947_v33 = vadd.f32 %v946_v32, %v945_v15 }
 0x519   :  { %v948_v20 = vrot.slane %v947_v33, 1 }
 0x51b   :  { %v949_v57 = vadd.f32 %v948_v20, %v947_v33  ;;  %v1933_v33 = vld [vmem:[#allocation5 + $0x30] sm:$0xff]   ;;  %v1934_v20 = vld [vmem:[#allocation5 + $0x28] sm:$0xff]  }
 0x51d   :  { %v950_v58 = vmul.f32 0.03125, %v949_v57  ;;  %v1935_v57 = vld [vmem:[#allocation5 + $0x20] sm:$0xff]  }
 0x51f   :  { %v2377_v61 = vsub.f32 %v851_v44, %v950_v58  ;;  %v2379_v1 = vsub.f32 %v854_v36, %v950_v58  ;;  %v2381_v2 = vsub.f32 %v859_v37, %v950_v58  ;;  %v2383_v34 = vsub.f32 %v867_v41, %v950_v58 }
 0x520   :  { %v2389_v40 = vsub.f32 %v862_v3, %v950_v58  ;;  %v2391_v54 = vsub.f32 %v870_v10, %v950_v58  ;;  %v2393_v35 = vsub.f32 %v875_v60, %v950_v58  ;;  %v2399_v41 = vsub.f32 %v878_v14, %v950_v58 }
 0x521   :  { %v967_v38 = vmul.f32 %v2377_v61, %v2377_v61  ;;  %v968_v39 = vmul.f32 %v2379_v1, %v2379_v1  ;;  %v969_v44 = vmul.f32 %v2381_v2, %v2381_v2  ;;  %v971_v36 = vmul.f32 %v2383_v34, %v2383_v34 }
 0x522   :  { %v970_v43 = vmul.f32 %v2389_v40, %v2389_v40  ;;  %v972_v3 = vmul.f32 %v2391_v54, %v2391_v54  ;;  %v2405_v10 = vsub.f32 %v883_v50, %v950_v58  ;;  %v973_v60 = vmul.f32 %v2393_v35, %v2393_v35 }
 0x523   :  { %v999_v37 = vadd.f32 %v968_v39, %v967_v38  ;;  %v987_v45 = vmul.f32 0.0, %v971_v36  ;;  %v2409_v48 = vsub.f32 %v886_v47, %v950_v58  ;;  %v974_v14 = vmul.f32 %v2399_v41, %v2399_v41  ;;  %v1937_v38 = vld [vmem:[#allocation5 + $0x10] sm:$0xff]   ;;  %v1938_v39 = vld [vmem:[#allocation5 + $0x8] sm:$0xff]  }
 0x524   :  { %v988_v22 = vmul.f32 0.0, %v972_v3  ;;  %v2413_v51 = vsub.f32 %v891_v62, %v950_v58  ;;  %v975_v25 = vmul.f32 %v2405_v10, %v2405_v10  ;;  %v989_v53 = vmul.f32 0.0, %v973_v60 }
 0x525   :  { %v1000_v28 = vadd.f32 %v999_v37, %v969_v44  ;;  %v2417_v55 = vsub.f32 %v894_v56, %v950_v58  ;;  %v976_v0 = vmul.f32 %v2409_v48, %v2409_v48  ;;  %v990_v46 = vmul.f32 0.0, %v974_v14  ;;  %v1939_v44 = vld [vmem:[#allocation5] sm:$0xff]  }
 0x526   :  { %v2421_v30 = vsub.f32 %v899_v6, %v950_v58  ;;  %v977_v31 = vmul.f32 %v2413_v51, %v2413_v51  ;;  %v991_v49 = vmul.f32 0.0, %v975_v25  ;;  %v2425_v42 = vsub.f32 %v902_v17, %v950_v58 }
 0x527   :  { %v1001_v18 = vadd.f32 %v1000_v28, %v970_v43  ;;  %v978_v5 = vmul.f32 %v2417_v55, %v2417_v55  ;;  %v992_v52 = vmul.f32 0.0, %v976_v0  ;;  %v2429_v59 = vsub.f32 %v907_v11, %v950_v58 }
 0x528   :  { %v979_v7 = vmul.f32 %v2421_v30, %v2421_v30  ;;  %v993_v8 = vmul.f32 0.0, %v977_v31  ;;  %v980_v63 = vmul.f32 %v2425_v42, %v2425_v42  ;;  %v2435_v13 = vsub.f32 %v910_v19, %v950_v58  ;;  %v1932_v19 = vld [vmem:[#allocation5 + $0x38] sm:$0xff]  }
 0x529   :  { %v1002_v26 = vadd.f32 %v1001_v18, %v987_v45  ;;  %v994_v16 = vmul.f32 0.0, %v978_v5  ;;  %v981_v4 = vmul.f32 %v2429_v59, %v2429_v59  ;;  %1816 = vmatprep.subr.bf16.mxu0 %v1932_v19  ;;  %v1936_v58 = vld [vmem:[#allocation5 + $0x18] sm:$0xff]  }
 0x52a   :  { %v995_v21 = vmul.f32 0.0, %v979_v7  ;;  %v996_v23 = vmul.f32 0.0, %v980_v63  ;;  %v982_v11 = vmul.f32 %v2435_v13, %v2435_v13  ;;  %1817 = vmatpush3.bf16.msra.mxu0 %v1932_v19 }
 0x52b   :  { %v1003_v50 = vadd.f32 %v1002_v26, %v988_v22  ;;  %v997_v9 = vmul.f32 0.0, %v981_v4  ;;  %1818 = vmatprep.subr.bf16.mxu0 %v1933_v33 }
 0x52c   :  { %v998_v29 = vmul.f32 0.0, %v982_v11 }
 0x52d   :  { %v1004_v47 = vadd.f32 %v1003_v50, %v989_v53 }
 0x52e   :  { %1819 = vmatpush3.bf16.msra.mxu0 %v1933_v33 }
 0x52f   :  { %v1005_v62 = vadd.f32 %v1004_v47, %v990_v46  ;;  %1820 = vmatprep.subr.bf16.mxu0 %v1934_v20 }
 0x531   :  { %v1006_v56 = vadd.f32 %v1005_v62, %v991_v49 }
 0x532   :  { %1821 = vmatpush3.bf16.msra.mxu0 %v1934_v20 }
 0x533   :  { %v1007_v6 = vadd.f32 %v1006_v56, %v992_v52  ;;  %1822 = vmatprep.subr.bf16.mxu0 %v1935_v57 }
 0x535   :  { %v1008_v17 = vadd.f32 %v1007_v6, %v993_v8 }
 0x536   :  { %1823 = vmatpush3.bf16.msra.mxu0 %v1935_v57 }
 0x537   :  { %v1009_v12 = vadd.f32 %v1008_v17, %v994_v16  ;;  %1824 = vmatprep.subr.bf16.mxu0 %v1936_v58 }
 0x539   :  { %v1010_v24 = vadd.f32 %v1009_v12, %v995_v21 }
 0x53a   :  { %1825 = vmatpush3.bf16.msra.mxu0 %v1936_v58 }
 0x53b   :  { %v1011_v27 = vadd.f32 %v1010_v24, %v996_v23  ;;  %1826 = vmatprep.subr.bf16.mxu0 %v1937_v38 }
 0x53d   :  { %v1012_v15 = vadd.f32 %v1011_v27, %v997_v9 }
 0x53e   :  { %1827 = vmatpush3.bf16.msra.mxu0 %v1937_v38 }
 0x53f   :  { %v1013_v32 = vadd.f32 %v1012_v15, %v998_v29  ;;  %1828 = vmatprep.subr.bf16.mxu0 %v1938_v39 }
 0x541   :  { %1014 = vadd.xlane.f32.xlu0 %v1013_v32 }
 0x542   :  { %1829 = vmatpush3.bf16.msra.mxu0 %v1938_v39 }
 0x543   :  { %1830 = vmatprep.subr.bf16.mxu0 %v1939_v44 }
 0x546   :  { %1831 = vmatpush3.bf16.msra.mxu0 %v1939_v44 }
 0x5ca   :  { %v1015_v36 = vpop.xlane.xlu0 %1014 }
 0x5cb   :  { %v1016_v37 = vrot.slane %v1015_v36, 4 }
 0x5cd   :  { %v1017_v43 = vadd.f32 %v1016_v37, %v1015_v36 }
 0x5cf   :  { %v1018_v3 = vrot.slane %v1017_v43, 2 }
 0x5d1   :  { %v1019_v28 = vadd.f32 %v1018_v3, %v1017_v43 }
 0x5d3   :  { %v1020_v60 = vrot.slane %v1019_v28, 1 }
 0x5d5   :  { %v1021_v45 = vadd.f32 %v1020_v60, %v1019_v28 }
 0x5d7   :  { %1898 = vpush %v1021_v45 }
 0x608   :  { %s1899_s5 = spop %1898 }
 0x609   :  { %v1023_v18 = vstv %s1899_s5 }
 0x60a   :  { %v1024_v14 = vmul.f32 0.03125, %v1023_v18 }
 0x60c   :  { %v1025_v22 = vadd.f32 1e-05, %v1024_v14 }
 0x60e   :  { %1974 = vrsqrt.f32 %v1025_v22 }
 0x61b   :  { %v1975_v26 = vpop.eup %1974 }
 0x61c   :  { %v1027_v25 = vmul.f32 %v1975_v26, %v2377_v61  ;;  %v1028_v53 = vmul.f32 %v1975_v26, %v2379_v1  ;;  %v1029_v50 = vmul.f32 %v1975_v26, %v2381_v2  ;;  %v1030_v0 = vmul.f32 %v1975_v26, %v2389_v40 }
 0x61d   :  { %v1031_v46 = vmul.f32 %v1975_v26, %v2383_v34  ;;  %v1032_v47 = vmul.f32 %v1975_v26, %v2391_v54  ;;  %v1033_v31 = vmul.f32 %v1975_v26, %v2393_v35  ;;  %v1034_v49 = vmul.f32 %v1975_v26, %v2399_v41 }
 0x61e   :  { %1976 = vtanh.f32 %v1027_v25  ;;  %v1035_v61 = vmul.f32 %v1975_v26, %v2405_v10  ;;  %v1036_v1 = vmul.f32 %v1975_v26, %v2409_v48  ;;  %v1037_v2 = vmul.f32 %v1975_v26, %v2413_v51 }
 0x61f   :  { %1978 = vtanh.f32 %v1028_v53  ;;  %v1038_v34 = vmul.f32 %v1975_v26, %v2417_v55  ;;  %v1039_v54 = vmul.f32 %v1975_v26, %v2421_v30  ;;  %v1040_v62 = vmul.f32 %v1975_v26, %v2425_v42  ;;  %v2073_v53 = vld [vmem:[%s2663_s0 + $0x8] sm:$0xff]  }
 0x620   :  { %1980 = vtanh.f32 %v1029_v50  ;;  %v1041_v7 = vmul.f32 %v1975_v26, %v2429_v59  ;;  %v1042_v42 = vmul.f32 %v1975_v26, %v2435_v13  ;;  %v2072_v13 = vld [vmem:[%s2663_s0] sm:$0xff]   ;;  %v2074_v50 = vld [vmem:[%s2663_s0 + $0x18] sm:$0xff]  }
 0x621   :  { %1982 = vtanh.f32 %v1030_v0  ;;  %v2075_v0 = vld [vmem:[%s2663_s0 + $0x20] sm:$0xff]  }
 0x622   :  { %1984 = vtanh.f32 %v1031_v46  ;;  %v2076_v46 = vld [vmem:[%s2663_s0 + $0x28] sm:$0xff]  }
 0x623   :  { %1986 = vtanh.f32 %v1032_v47  ;;  %v2077_v47 = vld [vmem:[%s2663_s0 + $0x30] sm:$0xff]  }
 0x624   :  { %1988 = vtanh.f32 %v1033_v31  ;;  %v2078_v31 = vld [vmem:[%s2663_s0 + $0x38] sm:$0xff]   ;;  %s2149_s0 = smov [#allocation7]  }
 0x625   :  { %1990 = vtanh.f32 %v1034_v49  ;;  %v1340_v49 = vlaneseq }
 0x626   :  { %1992 = vtanh.f32 %v1035_v61 }
 0x627   :  { %1994 = vtanh.f32 %v1036_v1  ;;  %v2478_v61 = vand.u32 127, %v1340_v49  ;;  %v1612_v1 = vld [vmem:[%s2670_s7] ss:$0 sm:$0xff]  ;;  %s1556_s7 = sshll.u32 %s2149_s0, 4  ;;  %s1557_s7 = int_to_ptr.vmem [resolvable:$true] %s1556_s7 }
 0x628   :  { %1996 = vtanh.f32 %v1037_v2  ;;  %s2119_s18 = scalar_lea.vmem %s1557_s7, 2048  ;;  %p2124_p11 = scmp.lt.s32.totalorder %s1557_s7, %s1557_s7 }
 0x629   :  { %1998 = vtanh.f32 %v1038_v34  ;;  %vm1342_vm1 = vcmp.lt.s32.totalorder %v2478_v61, 8  ;;  %p2120_p10 = scmp.ne.s32.totalorder %s1557_s7, %s2119_s18  ;;  %p2125_p12 = scmp.lt.s32.totalorder %s2119_s18, %s2119_s18 }
 0x62a   :  { %2000 = vtanh.f32 %v1039_v54 }
 0x62b   :  { %v1977_v40 = vpop.eup %1976  ;;  %2002 = vtanh.f32 %v1040_v62  ;;  %p2126_p13 = por %p2125_p12, %p2124_p11 }
 0x62c   :  { %v1979_v35 = vpop.eup %1978  ;;  %2004 = vtanh.f32 %v1041_v7 }
 0x62d   :  { %v1981_v41 = vpop.eup %1980  ;;  %v1059_v5 = vpack.c.bf16 %v1979_v35, %v1977_v40  ;;  %2006 = vtanh.f32 %v1042_v42  ;;  %p2127_p0 = pnand %p2126_p13, %p2120_p10 }
 0x62e   :  { %v1983_v10 = vpop.eup %1982 }
 0x62f   :  { %v1985_v48 = vpop.eup %1984  ;;  %1832 = vmatprep.mubr.bf16.mxu0 %v1059_v5  ;;  %v1060_v52 = vpack.c.bf16 %v1983_v10, %v1981_v41 }
 0x630   :  { %v1987_v56 = vpop.eup %1986 }
 0x631   :  { %1833 = vmatmul.mubr.bf16.vlgmr.msra.gmra.mxu0 %v1060_v52  ;;  %v1061_v51 = vpack.c.bf16 %v1987_v56, %v1985_v48  ;;  %v1989_v55 = vpop.eup %1988 }
 0x632   :  { %v1991_v30 = vpop.eup %1990 }
 0x633   :  { %1836 = vmatprep.mubr.bf16.mxu0 %v1061_v51  ;;  %v1993_v8 = vpop.eup %1992  ;;  %v1062_v63 = vpack.c.bf16 %v1991_v30, %v1989_v55 }
 0x634   :  { %v1995_v6 = vpop.eup %1994 }
 0x635   :  { %v1063_v16 = vpack.c.bf16 %v1995_v6, %v1993_v8  ;;  %v1997_v17 = vpop.eup %1996 }
 0x636   :  { %v1999_v4 = vpop.eup %1998 }
 0x637   :  { %v2001_v21 = vpop.eup %2000  ;;  %v1064_v23 = vpack.c.bf16 %v1999_v4, %v1997_v17 }
 0x638   :  { %v2003_v12 = vpop.eup %2002 }
 0x639   :  { %1837 = vmatmul.mubr.bf16.gmra.mxu0 %v1062_v63  ;;  %v1065_v11 = vpack.c.bf16 %v2003_v12, %v2001_v21  ;;  %v2005_v59 = vpop.eup %2004 }
 0x63a   :  { %1840 = vmatprep.mubr.bf16.mxu0 %v1063_v16  ;;  %v2007_v24 = vpop.eup %2006 }
 0x63b   :  { %v1066_v9 = vpack.c.bf16 %v2007_v24, %v2005_v59 }
 0x641   :  { %1841 = vmatmul.mubr.bf16.gmra.mxu0 %v1064_v23 }
 0x642   :  { %1844 = vmatprep.mubr.bf16.mxu0 %v1065_v11 }
 0x649   :  { %1845 = vmatmul.mubr.bf16.gmra.mxu0 %v1066_v9 }
 0x64a   :  { %1864 = vmatprep.mubr.bf16.mxu0 %v2072_v13 }
 0x6f1   :  { %v1834_v27 = vpop.f32.mrf.mxu0 }
 0x6f3   :  { %v1165_v29 = vpop.f32.mrf.mxu0 }
 0x6f5   :  { %v1835_v15 = vpop.f32.mrf.mxu0 }
 0x6f6   :  { %v1229_v26 = vpack.c.bf16 %v1835_v15, %v1834_v27 }
 0x6f7   :  { %v1168_v32 = vpop.f32.mrf.mxu0 }
 0x6f8   :  { %v1228_v25 = vpack.c.bf16 %v1168_v32, %v1165_v29 }
 0x6f9   :  { %v1838_v19 = vpop.f32.mrf.mxu0 }
 0x6fb   :  { %v1181_v33 = vpop.f32.mrf.mxu0 }
 0x6fd   :  { %v1839_v20 = vpop.f32.mrf.mxu0 }
 0x6fe   :  { %v1231_v14 = vpack.c.bf16 %v1839_v20, %v1838_v19 }
 0x6ff   :  { %v1184_v57 = vpop.f32.mrf.mxu0 }
 0x700   :  { %v1230_v22 = vpack.c.bf16 %v1184_v57, %v1181_v33 }
 0x701   :  { %v1842_v58 = vpop.f32.mrf.mxu0 }
 0x703   :  { %v1197_v38 = vpop.f32.mrf.mxu0 }
 0x705   :  { %v1843_v39 = vpop.f32.mrf.mxu0 }
 0x706   :  { %v1233_v45 = vpack.c.bf16 %v1843_v39, %v1842_v58 }
 0x707   :  { %v1200_v44 = vpop.f32.mrf.mxu0 }
 0x708   :  { %v1232_v18 = vpack.c.bf16 %v1200_v44, %v1197_v38 }
 0x709   :  { %v1846_v36 = vpop.f32.mrf.mxu0 }
 0x70b   :  { %v1213_v37 = vpop.f32.mrf.mxu0 }
 0x70d   :  { %v1847_v43 = vpop.f32.mrf.mxu0 }
 0x70e   :  { %v1235_v3 = vpack.c.bf16 %v1847_v43, %v1846_v36 }
 0x70f   :  { %v1216_v28 = vpop.f32.mrf.mxu0 }
 0x710   :  { %v1234_v60 = vpack.c.bf16 %v1216_v28, %v1213_v37  ;;  %1848 = vmatprep.subr.bf16.mxu0 %v1235_v3  ;;  %1880 = vmatprep.subr.bf16.mxu1 %v1235_v3 }
 0x711   :  { %1849 = vmatpush3.bf16.msra.mxu0 %v1235_v3  ;;  %1888 = vmatpush3.bf16.msra.mxu1 %v1235_v3 }
 0x712   :  { %1850 = vmatprep.subr.bf16.mxu0 %v1234_v60  ;;  %1881 = vmatprep.subr.bf16.mxu1 %v1234_v60 }
 0x715   :  { %1851 = vmatpush3.bf16.msra.mxu0 %v1234_v60  ;;  %1889 = vmatpush3.bf16.msra.mxu1 %v1234_v60 }
 0x716   :  { %1852 = vmatprep.subr.bf16.mxu0 %v1233_v45  ;;  %1882 = vmatprep.subr.bf16.mxu1 %v1233_v45 }
 0x719   :  { %1853 = vmatpush3.bf16.msra.mxu0 %v1233_v45  ;;  %1890 = vmatpush3.bf16.msra.mxu1 %v1233_v45 }
 0x71a   :  { %1854 = vmatprep.subr.bf16.mxu0 %v1232_v18  ;;  %1883 = vmatprep.subr.bf16.mxu1 %v1232_v18 }
 0x71d   :  { %1855 = vmatpush3.bf16.msra.mxu0 %v1232_v18  ;;  %1891 = vmatpush3.bf16.msra.mxu1 %v1232_v18 }
 0x71e   :  { %1856 = vmatprep.subr.bf16.mxu0 %v1231_v14  ;;  %1884 = vmatprep.subr.bf16.mxu1 %v1231_v14 }
 0x721   :  { %1857 = vmatpush3.bf16.msra.mxu0 %v1231_v14  ;;  %1892 = vmatpush3.bf16.msra.mxu1 %v1231_v14 }
 0x722   :  { %1858 = vmatprep.subr.bf16.mxu0 %v1230_v22  ;;  %1885 = vmatprep.subr.bf16.mxu1 %v1230_v22 }
 0x725   :  { %1859 = vmatpush3.bf16.msra.mxu0 %v1230_v22  ;;  %1893 = vmatpush3.bf16.msra.mxu1 %v1230_v22 }
 0x726   :  { %1860 = vmatprep.subr.bf16.mxu0 %v1229_v26  ;;  %1886 = vmatprep.subr.bf16.mxu1 %v1229_v26 }
 0x729   :  { %1861 = vmatpush3.bf16.msra.mxu0 %v1229_v26  ;;  %1894 = vmatpush3.bf16.msra.mxu1 %v1229_v26 }
 0x72a   :  { %1862 = vmatprep.subr.bf16.mxu0 %v1228_v25  ;;  %1887 = vmatprep.subr.bf16.mxu1 %v1228_v25 }
 0x72d   :  { %1863 = vmatpush3.bf16.msra.mxu0 %v1228_v25  ;;  %1895 = vmatpush3.bf16.msra.mxu1 %v1228_v25 }
 0x730   :  { %1865 = vmatmul.mubr.bf16.vlgmr.msra.gmra.mxu0 %v2073_v53  ;;  %1869 = vmatmul.mubr.bf16.vlgmr.msra.gmra.mxu1 %v2074_v50 }
 0x731   :  { %1872 = vmatprep.mubr.bf16.mxu1 %v2075_v0 }
 0x738   :  { %1873 = vmatmul.mubr.bf16.gmra.mxu1 %v2076_v46 }
 0x739   :  { %1876 = vmatprep.mubr.bf16.mxu1 %v2077_v47 }
 0x740   :  { %1877 = vmatmul.mubr.bf16.gmra.mxu1 %v2078_v31 }
 0x7f0   :  { %v1866_v2 = vpop.f32.mrf.mxu0  ;;  %v1870_v34 = vpop.f32.mrf.mxu1 }
 0x7f1   :  { %v1286_v40 = vadd.f32 %v1866_v2, %v1612_v1  ;;  %v1302_v54 = vadd.f32 %v1870_v34, %v1612_v1 }
 0x7f2   :  { %v1277_v35 = vpop.f32.mrf.mxu0  ;;  %v1293_v62 = vpop.f32.mrf.mxu1 }
 0x7f3   :  { %v1278_v41 = vadd.f32 %v1612_v1, %v1277_v35  ;;  %v2486_v5 = vsel %vm1342_vm1, %v1286_v40, -1e+30  ;;  %v2495_v51 = vsel %vm1342_vm1, %v1302_v54, -1e+30  ;;  %v1294_v7 = vadd.f32 %v1612_v1, %v1293_v62 }
 0x7f4   :  { %1363 = vmax.xlane.f32.xlu0 %v2486_v5  ;;  %v1867_v10 = vpop.f32.mrf.mxu0  ;;  %v1871_v48 = vpop.f32.mrf.mxu1 }
 0x7f5   :  { %v1289_v52 = vadd.f32 %v1867_v10, %v1612_v1  ;;  %v2491_v56 = vsel %vm1342_vm1, %v1278_v41, -1e+30  ;;  %v1305_v42 = vadd.f32 %v1871_v48, %v1612_v1  ;;  %v2506_v17 = vsel %vm1342_vm1, %v1294_v7, -1e+30 }
 0x7f6   :  { %1359 = vmax.xlane.f32.xlu1 %v2491_v56  ;;  %v1296_v55 = vpop.f32.mrf.mxu1  ;;  %v1280_v63 = vpop.f32.mrf.mxu0 }
 0x7f7   :  { %v2501_v6 = vsel %vm1342_vm1, %v1289_v52, -1e+30  ;;  %v1281_v21 = vadd.f32 %v1612_v1, %v1280_v63  ;;  %v2511_v23 = vsel %vm1342_vm1, %v1305_v42, -1e+30  ;;  %v1297_v9 = vadd.f32 %v1612_v1, %v1296_v55 }
 0x7f8   :  { %1371 = vmax.xlane.f32.xlu0 %v2495_v51  ;;  %v1874_v30 = vpop.f32.mrf.mxu1 }
 0x7f9   :  { %v1318_v8 = vadd.f32 %v1874_v30, %v1612_v1  ;;  %v2521_v13 = vsel %vm1342_vm1, %v1281_v21, -1e+30  ;;  %v2531_v33 = vsel %vm1342_vm1, %v1297_v9, -1e+30 }
 0x7fa   :  { %1365 = vmax.xlane.f32.xlu1 %v2501_v6  ;;  %v1309_v16 = vpop.f32.mrf.mxu1 }
 0x7fb   :  { %v1310_v12 = vadd.f32 %v1612_v1, %v1309_v16  ;;  %v2515_v11 = vsel %vm1342_vm1, %v1318_v8, -1e+30 }
 0x7fc   :  { %1367 = vmax.xlane.f32.xlu0 %v2506_v17  ;;  %v1875_v4 = vpop.f32.mrf.mxu1 }
 0x7fd   :  { %v2525_v27 = vsel %vm1342_vm1, %v1310_v12, -1e+30  ;;  %v1321_v32 = vadd.f32 %v1875_v4, %v1612_v1 }
 0x7fe   :  { %1373 = vmax.xlane.f32.xlu1 %v2511_v23  ;;  %v1312_v59 = vpop.f32.mrf.mxu1 }
 0x7ff   :  { %v1313_v58 = vadd.f32 %v1612_v1, %v1312_v59  ;;  %v2541_v38 = vsel %vm1342_vm1, %v1321_v32, -1e+30 }
 0x800   :  { %1379 = vmax.xlane.f32.xlu0 %v2515_v11  ;;  %v1878_v24 = vpop.f32.mrf.mxu1 }
 0x801   :  { %v1334_v19 = vadd.f32 %v1878_v24, %v1612_v1  ;;  %v2551_v37 = vsel %vm1342_vm1, %v1313_v58, -1e+30 }
 0x802   :  { %1361 = vmax.xlane.f32.xlu1 %v2521_v13  ;;  %v1325_v29 = vpop.f32.mrf.mxu1 }
 0x803   :  { %v1326_v15 = vadd.f32 %v1612_v1, %v1325_v29  ;;  %v2545_v39 = vsel %vm1342_vm1, %v1334_v19, -1e+30 }
 0x804   :  { %1375 = vmax.xlane.f32.xlu0 %v2525_v27  ;;  %v1879_v57 = vpop.f32.mrf.mxu1 }
 0x805   :  { %v2535_v20 = vsel %vm1342_vm1, %v1326_v15, -1e+30  ;;  %v1337_v43 = vadd.f32 %v1879_v57, %v1612_v1 }
 0x806   :  { %1369 = vmax.xlane.f32.xlu1 %v2531_v33  ;;  %v1328_v44 = vpop.f32.mrf.mxu1 }
 0x807   :  { %v1329_v36 = vadd.f32 %v1612_v1, %v1328_v44  ;;  %v2561_v28 = vsel %vm1342_vm1, %v1337_v43, -1e+30 }
 0x808   :  { %1383 = vmax.xlane.f32.xlu0 %v2535_v20 }
 0x809   :  { %v2556_v3 = vsel %vm1342_vm1, %v1329_v36, -1e+30 }
 0x80a   :  { %1381 = vmax.xlane.f32.xlu1 %v2541_v38 }
 0x80c   :  { %1387 = vmax.xlane.f32.xlu0 %v2545_v39 }
 0x80e   :  { %1377 = vmax.xlane.f32.xlu1 %v2551_v37 }
 0x812   :  { %1385 = vmax.xlane.f32.xlu1 %v2556_v3 }
 0x816   :  { %1389 = vmax.xlane.f32.xlu1 %v2561_v28 }
 0x87d   :  { %v2564_v60 = vpop.xlane.xlu0 %1363 }
 0x87e   :  { %v1393_v45 = vsub.f32 %v2486_v5, %v2564_v60 }
 0x87f   :  { %v2568_v18 = vpop.xlane.xlu1 %1359 }
 0x880   :  { %v1411_v14 = vmul.f32 1.442695, %v1393_v45  ;;  %v1391_v26 = vsub.f32 %v2491_v56, %v2568_v18 }
 0x881   :  { %v2570_v22 = vpop.xlane.xlu0 %1371 }
 0x882   :  { %2008 = vpow2.f32 %v1411_v14  ;;  %v1397_v25 = vsub.f32 %v2495_v51, %v2570_v22  ;;  %v1407_v47 = vmul.f32 1.442695, %v1391_v26 }
 0x883   :  { %v2576_v53 = vpop.xlane.xlu1 %1365 }
 0x884   :  { %v1419_v50 = vmul.f32 1.442695, %v1397_v25  ;;  %v1394_v0 = vsub.f32 %v2501_v6, %v2576_v53 }
 0x885   :  { %v2580_v46 = vpop.xlane.xlu0 %1367 }
 0x886   :  { %2010 = vpow2.f32 %v1419_v50  ;;  %v1413_v31 = vmul.f32 1.442695, %v1394_v0  ;;  %v1395_v49 = vsub.f32 %v2506_v17, %v2580_v46 }
 0x887   :  { %v2584_v61 = vpop.xlane.xlu1 %1373 }
 0x888   :  { %2012 = vpow2.f32 %v1413_v31  ;;  %v1398_v1 = vsub.f32 %v2511_v23, %v2584_v61  ;;  %v1415_v34 = vmul.f32 1.442695, %v1395_v49 }
 0x889   :  { %v2588_v2 = vpop.xlane.xlu0 %1379  ;;  %2014 = vpow2.f32 %v1407_v47 }
 0x88a   :  { %v1421_v40 = vmul.f32 1.442695, %v1398_v1  ;;  %v1401_v54 = vsub.f32 %v2515_v11, %v2588_v2 }
 0x88b   :  { %v2592_v35 = vpop.xlane.xlu1 %1361 }
 0x88c   :  { %2016 = vpow2.f32 %v1421_v40  ;;  %v1392_v62 = vsub.f32 %v2521_v13, %v2592_v35  ;;  %v1427_v10 = vmul.f32 1.442695, %v1401_v54 }
 0x88d   :  { %v2596_v41 = vpop.xlane.xlu0 %1375  ;;  %2018 = vpow2.f32 %v1415_v34 }
 0x88e   :  { %v1409_v48 = vmul.f32 1.442695, %v1392_v62  ;;  %v1399_v52 = vsub.f32 %v2525_v27, %v2596_v41 }
 0x88f   :  { %v2009_v55 = vpop.eup %2008  ;;  %v2600_v7 = vpop.xlane.xlu1 %1369 }
 0x890   :  { %2020 = vpow2.f32 %v1409_v48  ;;  %v1396_v30 = vsub.f32 %v2531_v33, %v2600_v7  ;;  %1443 = vadd.xlane.f32.xlu0 %v2009_v55  ;;  %v1423_v8 = vmul.f32 1.442695, %v1399_v52 }
 0x891   :  { %v2604_v42 = vpop.xlane.xlu0 %1383  ;;  %2022 = vpow2.f32 %v1427_v10 }
 0x892   :  { %v1417_v63 = vmul.f32 1.442695, %v1396_v30  ;;  %v1403_v16 = vsub.f32 %v2535_v20, %v2604_v42 }
 0x893   :  { %v2011_v4 = vpop.eup %2010  ;;  %v2608_v21 = vpop.xlane.xlu1 %1381 }
 0x894   :  { %2024 = vpow2.f32 %v1417_v63  ;;  %v1402_v12 = vsub.f32 %v2541_v38, %v2608_v21  ;;  %1451 = vadd.xlane.f32.xlu0 %v2011_v4  ;;  %v1431_v9 = vmul.f32 1.442695, %v1403_v16 }
 0x895   :  { %v2013_v59 = vpop.eup %2012  ;;  %v2612_v24 = vpop.xlane.xlu0 %1387  ;;  %2026 = vpow2.f32 %v1423_v8 }
 0x896   :  { %v1429_v29 = vmul.f32 1.442695, %v1402_v12  ;;  %v1405_v15 = vsub.f32 %v2545_v39, %v2612_v24  ;;  %1445 = vadd.xlane.f32.xlu1 %v2013_v59  ;;  %v2015_v32 = vpop.eup %2014 }
 0x897   :  { %v2616_v19 = vpop.xlane.xlu1 %1377 }
 0x898   :  { %2028 = vpow2.f32 %v1429_v29  ;;  %v1400_v57 = vsub.f32 %v2551_v37, %v2616_v19  ;;  %1439 = vadd.xlane.f32.xlu0 %v2015_v32  ;;  %v1435_v44 = vmul.f32 1.442695, %v1405_v15 }
 0x899   :  { %v2017_v58 = vpop.eup %2016  ;;  %2030 = vpow2.f32 %v1431_v9 }
 0x89a   :  { %v1425_v36 = vmul.f32 1.442695, %v1400_v57  ;;  %1453 = vadd.xlane.f32.xlu1 %v2017_v58  ;;  %v2019_v43 = vpop.eup %2018 }
 0x89b   :  { %v2620_v45 = vpop.xlane.xlu1 %1385 }
 0x89c   :  { %2032 = vpow2.f32 %v1425_v36  ;;  %v1404_v14 = vsub.f32 %v2556_v3, %v2620_v45  ;;  %1447 = vadd.xlane.f32.xlu0 %v2019_v43 }
 0x89d   :  { %v2021_v26 = vpop.eup %2020  ;;  %2034 = vpow2.f32 %v1435_v44 }
 0x89e   :  { %v1433_v25 = vmul.f32 1.442695, %v1404_v14  ;;  %1441 = vadd.xlane.f32.xlu1 %v2021_v26  ;;  %v2023_v50 = vpop.eup %2022 }
 0x89f   :  { %v2624_v0 = vpop.xlane.xlu1 %1389 }
 0x8a0   :  { %2036 = vpow2.f32 %v1433_v25  ;;  %v1406_v47 = vsub.f32 %v2561_v28, %v2624_v0  ;;  %1459 = vadd.xlane.f32.xlu0 %v2023_v50 }
 0x8a1   :  { %v2025_v31 = vpop.eup %2024 }
 0x8a2   :  { %v1437_v49 = vmul.f32 1.442695, %v1406_v47  ;;  %1449 = vadd.xlane.f32.xlu1 %v2025_v31  ;;  %v2027_v1 = vpop.eup %2026 }
 0x8a4   :  { %2038 = vpow2.f32 %v1437_v49  ;;  %1455 = vadd.xlane.f32.xlu0 %v2027_v1 }
 0x8a5   :  { %v2029_v34 = vpop.eup %2028 }
 0x8a6   :  { %1461 = vadd.xlane.f32.xlu1 %v2029_v34  ;;  %v2031_v40 = vpop.eup %2030 }
 0x8a8   :  { %1463 = vadd.xlane.f32.xlu0 %v2031_v40 }
 0x8a9   :  { %v2033_v54 = vpop.eup %2032 }
 0x8aa   :  { %1457 = vadd.xlane.f32.xlu1 %v2033_v54  ;;  %v2035_v62 = vpop.eup %2034 }
 0x8ac   :  { %1467 = vadd.xlane.f32.xlu0 %v2035_v62 }
 0x8ad   :  { %v2037_v10 = vpop.eup %2036 }
 0x8ae   :  { %1465 = vadd.xlane.f32.xlu1 %v2037_v10 }
 0x8b1   :  { %v2039_v48 = vpop.eup %2038 }
 0x8b2   :  { %1469 = vadd.xlane.f32.xlu1 %v2039_v48 }
 0x919   :  { %v1444_v52 = vpop.xlane.xlu0 %1443 }
 0x91a   :  { %2040 = vlog2.f32 %v1444_v52 }
 0x91d   :  { %v1452_v55 = vpop.xlane.xlu0 %1451 }
 0x91e   :  { %2042 = vlog2.f32 %v1452_v55 }
 0x91f   :  { %v1446_v30 = vpop.xlane.xlu1 %1445 }
 0x920   :  { %2044 = vlog2.f32 %v1446_v30 }
 0x921   :  { %v1440_v8 = vpop.xlane.xlu0 %1439 }
 0x922   :  { %2046 = vlog2.f32 %v1440_v8 }
 0x923   :  { %v1454_v63 = vpop.xlane.xlu1 %1453 }
 0x924   :  { %2048 = vlog2.f32 %v1454_v63 }
 0x925   :  { %v1448_v16 = vpop.xlane.xlu0 %1447 }
 0x926   :  { %2050 = vlog2.f32 %v1448_v16 }
 0x927   :  { %v2041_v4 = vpop.eup %2040  ;;  %v1442_v12 = vpop.xlane.xlu1 %1441 }
 0x928   :  { %v1476_v59 = vmul.f32 0.6931472, %v2041_v4  ;;  %2052 = vlog2.f32 %v1442_v12 }
 0x929   :  { %v1460_v9 = vpop.xlane.xlu0 %1459 }
 0x92a   :  { %v1505_v29 = vadd.f32 %v1476_v59, %v2564_v60  ;;  %2054 = vlog2.f32 %v1460_v9 }
 0x92b   :  { %v2043_v15 = vpop.eup %2042  ;;  %v1450_v32 = vpop.xlane.xlu1 %1449 }
 0x92c   :  { %v1521_v57 = vsub.f32 %v2486_v5, %v1505_v29  ;;  %v1484_v58 = vmul.f32 0.6931472, %v2043_v15  ;;  %2056 = vlog2.f32 %v1450_v32 }
 0x92d   :  { %v2045_v44 = vpop.eup %2044  ;;  %v1456_v36 = vpop.xlane.xlu0 %1455 }
 0x92e   :  { %1537 = vst [vmem:[#allocation7 + $0x10] sm:$0xff] %v1521_v57  ;;  %v1509_v43 = vadd.f32 %v1484_v58, %v2570_v22  ;;  %v1478_v14 = vmul.f32 0.6931472, %v2045_v44  ;;  %2058 = vlog2.f32 %v1456_v36 }
 0x92f   :  { %v2047_v26 = vpop.eup %2046  ;;  %v1462_v25 = vpop.xlane.xlu1 %1461 }
 0x930   :  { %v1525_v50 = vsub.f32 %v2495_v51, %v1509_v43  ;;  %v1506_v60 = vadd.f32 %v1478_v14, %v2576_v53  ;;  %v1472_v47 = vmul.f32 0.6931472, %v2047_v26  ;;  %2060 = vlog2.f32 %v1462_v25 }
 0x931   :  { %v2049_v31 = vpop.eup %2048  ;;  %v1464_v49 = vpop.xlane.xlu0 %1463 }
 0x932   :  { %1541 = vst [vmem:[#allocation7 + $0x30] sm:$0xff] %v1525_v50  ;;  %v1522_v5 = vsub.f32 %v2501_v6, %v1506_v60  ;;  %v1503_v1 = vadd.f32 %v1472_v47, %v2568_v18  ;;  %v1486_v34 = vmul.f32 0.6931472, %v2049_v31  ;;  %2062 = vlog2.f32 %v1464_v49 }
 0x933   :  { %v2051_v22 = vpop.eup %2050  ;;  %v1458_v40 = vpop.xlane.xlu1 %1457 }
 0x934   :  { %1538 = vst [vmem:[#allocation7 + $0x18] sm:$0xff] %v1522_v5  ;;  %v1519_v54 = vsub.f32 %v2491_v56, %v1503_v1  ;;  %v1510_v51 = vadd.f32 %v1486_v34, %v2584_v61  ;;  %v1480_v62 = vmul.f32 0.6931472, %v2051_v22  ;;  %2064 = vlog2.f32 %v1458_v40 }
 0x935   :  { %v2053_v53 = vpop.eup %2052  ;;  %v1468_v10 = vpop.xlane.xlu0 %1467 }
 0x936   :  { %1535 = vst [vmem:[#allocation7] sm:$0xff] %v1519_v54  ;;  %v1526_v48 = vsub.f32 %v2511_v23, %v1510_v51  ;;  %v1507_v6 = vadd.f32 %v1480_v62, %v2580_v46  ;;  %v1474_v52 = vmul.f32 0.6931472, %v2053_v53  ;;  %2066 = vlog2.f32 %v1468_v10 }
 0x937   :  { %v2055_v18 = vpop.eup %2054  ;;  %v1466_v55 = vpop.xlane.xlu1 %1465 }
 0x938   :  { %1542 = vst [vmem:[#allocation7 + $0x38] sm:$0xff] %v1526_v48  ;;  %v1523_v30 = vsub.f32 %v2506_v17, %v1507_v6  ;;  %v1504_v56 = vadd.f32 %v1474_v52, %v2592_v35  ;;  %v1492_v8 = vmul.f32 0.6931472, %v2055_v18  ;;  %2068 = vlog2.f32 %v1466_v55 }
 0x939   :  { %v2057_v61 = vpop.eup %2056 }
 0x93a   :  { %1539 = vst [vmem:[#allocation7 + $0x20] sm:$0xff] %v1523_v30  ;;  %v1520_v63 = vsub.f32 %v2521_v13, %v1504_v56  ;;  %v1513_v16 = vadd.f32 %v1492_v8, %v2588_v2  ;;  %v1482_v23 = vmul.f32 0.6931472, %v2057_v61 }
 0x93b   :  { %v2059_v4 = vpop.eup %2058  ;;  %v1470_v46 = vpop.xlane.xlu1 %1469 }
 0x93c   :  { %1536 = vst [vmem:[#allocation7 + $0x8] sm:$0xff] %v1520_v63  ;;  %v1529_v12 = vsub.f32 %v2515_v11, %v1513_v16  ;;  %v1508_v59 = vadd.f32 %v1482_v23, %v2600_v7  ;;  %v1488_v9 = vmul.f32 0.6931472, %v2059_v4  ;;  %2070 = vlog2.f32 %v1470_v46 }
 0x93d   :  { %v2061_v17 = vpop.eup %2060 }
 0x93e   :  { %1545 = vst [vmem:[#allocation7 + $0x50] sm:$0xff] %v1529_v12  ;;  %v1524_v35 = vsub.f32 %v2531_v33, %v1508_v59  ;;  %v1511_v29 = vadd.f32 %v1488_v9, %v2596_v41  ;;  %v1494_v15 = vmul.f32 0.6931472, %v2061_v17 }
 0x93f   :  { %v2063_v13 = vpop.eup %2062 }
 0x940   :  { %1540 = vst [vmem:[#allocation7 + $0x28] sm:$0xff] %v1524_v35  ;;  %v1527_v2 = vsub.f32 %v2525_v27, %v1511_v29  ;;  %v1514_v32 = vadd.f32 %v1494_v15, %v2608_v21  ;;  %v1496_v57 = vmul.f32 0.6931472, %v2063_v13 }
 0x941   :  { %v2065_v58 = vpop.eup %2064 }
 0x942   :  { %1543 = vst [vmem:[#allocation7 + $0x40] sm:$0xff] %v1527_v2  ;;  %v1530_v11 = vsub.f32 %v2541_v38, %v1514_v32  ;;  %v1515_v7 = vadd.f32 %v1496_v57, %v2604_v42  ;;  %v1490_v44 = vmul.f32 0.6931472, %v2065_v58 }
 0x943   :  { %v2067_v36 = vpop.eup %2066 }
 0x944   :  { %1546 = vst [vmem:[#allocation7 + $0x58] sm:$0xff] %v1530_v11  ;;  %v1531_v33 = vsub.f32 %v2535_v20, %v1515_v7  ;;  %v1512_v41 = vadd.f32 %v1490_v44, %v2616_v19  ;;  %v1500_v43 = vmul.f32 0.6931472, %v2067_v36 }
 0x945   :  { %v2069_v14 = vpop.eup %2068 }
 0x946   :  { %1547 = vst [vmem:[#allocation7 + $0x60] sm:$0xff] %v1531_v33  ;;  %v1528_v27 = vsub.f32 %v2551_v37, %v1512_v41  ;;  %v1517_v21 = vadd.f32 %v1500_v43, %v2612_v24  ;;  %v1498_v26 = vmul.f32 0.6931472, %v2069_v14 }
 0x948   :  { %1544 = vst [vmem:[#allocation7 + $0x48] sm:$0xff] %v1528_v27  ;;  %v1533_v38 = vsub.f32 %v2545_v39, %v1517_v21  ;;  %v1516_v42 = vadd.f32 %v1498_v26, %v2620_v45 }
 0x949   :  { %v2071_v25 = vpop.eup %2070 }
 0x94a   :  { %1549 = vst [vmem:[#allocation7 + $0x70] sm:$0xff] %v1533_v38  ;;  %v1532_v50 = vsub.f32 %v2556_v3, %v1516_v42  ;;  %v1502_v20 = vmul.f32 0.6931472, %v2071_v25 }
 0x94c   :  { %1548 = vst [vmem:[#allocation7 + $0x68] sm:$0xff] %v1532_v50  ;;  %v1518_v19 = vadd.f32 %v1502_v20, %v2624_v0 }
 0x94e   :  { %v1534_v37 = vsub.f32 %v2561_v28, %v1518_v19 }
 0x950   :  { %1550 = vst [vmem:[#allocation7 + $0x78] sm:$0xff] %v1534_v37 }
 0x951   :  { %2130 = shalt.err (!%p2127_p0)
}
 0x952   :  { %s2150_s19 = smov 128   ;;  %s2151_s20 = smov 8  }
 0x953   :  { %1562 = dma.vmem_to_hbm [thread:$0]  %s1557_s7, 2048, %s2671_s8, [#allocation4], %s2150_s19, %s2150_s19, %s2151_s20  }
 0x954   :  { %2143 = dma.done.wait [#allocation4], 2048  }
 0x955   :  { %2144 = vsyncadd [#allocation4], 4294965248 }
 0x956   :  { %1566 = vsyncpa [#allocation3], 1 }
 0x957   :  { %1567 = vsyncpa [#allocation6], 1 }
 0x958   :  { %1568 = vsyncpa [#allocation4], 1 }

</bundles_post_ra>
